<compile_context>
chip_gen: v6e
topology: v6e:2x2x1
jax: 0.10.0
libtpu: 0.0.40
codegen_flags: <defaults>
</compile_context>

<pallas_src>
import functools

import jax
import jax.numpy as jnp
from jax.experimental import pallas as pl
from jax.experimental.pallas import tpu as pltpu


def _attention_kernel(x_ref, wqkv_ref, wproj_ref, bproj_ref, o_ref, *, num_heads):
    block_b, N, C = x_ref.shape
    H = num_heads
    hd = C // H
    T = block_b * N
    G = block_b * H

    # ---- fused QKV projection over the whole batch tile (bf16 MXU, f32 acc) ----
    # The softmax scale is pre-folded into the q columns of Wqkv host-side.
    x2 = x_ref[...].reshape(T, C).astype(jnp.bfloat16)                      # (T, C)
    qkv = jnp.dot(x2, wqkv_ref[...], preferred_element_type=jnp.float32)    # (T, 3C) f32
    qkv = qkv.reshape(block_b, N, 3 * C)

    # Column layout matches torch's reshape(B, N, 3, H, hd): blocks [q|k|v] of
    # width C; head h occupies columns [h*hd, (h+1)*hd) of its block.  The head
    # split is done ONCE per grid step and collapsed into a single (block_b*H)
    # einsum batch axis.
    def split_heads(base):
        hs = [qkv[:, :, base + h * hd: base + (h + 1) * hd] for h in range(H)]
        x4 = jnp.stack(hs, axis=1)                                           # (bB, H, N, hd)
        return x4.reshape(G, N, hd).astype(jnp.bfloat16)

    q3 = split_heads(0)          # scale already folded into the weight
    k3 = split_heads(C)
    v3 = split_heads(2 * C)

    # Scores for every (batch, head) in one batched MXU issue:
    #   (G, N, hd) x (G, M, hd) -> (G, N, M)
    # TODO(synk): for production sequence lengths, replace the dense (G, N, N)
    # scores with a kv-tiled flash softmax (online max/sum over key tiles).
    s = jnp.einsum('gnd,gmd->gnm', q3, k3, preferred_element_type=jnp.float32)

    # Softmax over keys in f32 (v5e-safe); EUP approximate reciprocal for the denom.
    m = jnp.max(s, axis=-1, keepdims=True)
    p = jnp.exp(s - m)
    denom = jnp.sum(p, axis=-1, keepdims=True)
    attn = p * pl.reciprocal(denom, approx=True)                             # (G, N, N) f32
    # attn_drop is identity (p = 0.0 / eval mode).

    # PV in transposed form (no per-batch v.T):
    #   outT[g, d, n] = sum_m v[g, m, d] * attn[g, n, m]
    outT = jnp.einsum('gmd,gnm->gdn', v3, attn.astype(jnp.bfloat16),
                      preferred_element_type=jnp.float32)                    # (G, hd, N)

    # (G, hd, N) -> (block_b, C, N): merge heads into the sublane axis (hd % 8 == 0),
    # then ONE batched minor-dim transpose gives the lane-dense (N, C) slab used by
    # the projection matmul and the output store.
    out_cn = outT.reshape(block_b, C, N)
    out_nc = jnp.transpose(out_cn, (0, 2, 1)).reshape(T, C).astype(jnp.bfloat16)

    y = jnp.dot(out_nc, wproj_ref[...], preferred_element_type=jnp.float32)
    y = y + bproj_ref[...]                                                   # (T, C) f32
    # proj_drop is identity (p = 0.0 / eval mode).

    o_ref[...] = y.reshape(block_b, N, C).astype(o_ref.dtype)                # lane-dense store


def _choose_block_b(B, N, H, C, *, target_rows=256, tile_budget_bytes=24 * 1024 * 1024):
    """Pick the batch tile: largest whose f32 intermediates fit the budget, with
    block_b*N pushed toward a full MXU M-tile, while preferring >= 2 grid steps
    (v7x has 2 TensorCores sharing the 'parallel' grid axis)."""
    if N % 8 != 0:
        return 1

    def tile_bytes(d):
        t = d * N
        scores = d * H * N * N * 4            # s / p / attn (f32), ~2x live at once
        qkv = t * 3 * C * 4                   # fused projection output (f32)
        io = 2 * 2 * t * C * 4                # double-buffered x / out tiles
        return 2 * scores + qkv + io

    divs = [d for d in range(1, B + 1) if B % d == 0 and tile_bytes(d) <= tile_budget_bytes]
    if not divs:
        return 1
    multi = [d for d in divs if B // d >= 2]
    cands = multi if multi else divs
    hits = [d for d in cands if d * N >= target_rows]
    return hits[0] if hits else cands[-1]


def attention_pallas(x, wqkv_t, wproj_t, bproj, *, num_heads, block_b=None):
    """x: (B, N, C); wqkv_t: (C, 3C); wproj_t: (C, C); bproj: (C,)."""
    B, N, C = x.shape
    assert C % num_heads == 0
    head_dim = C // num_heads
    assert head_dim % 8 == 0, "head_dim must be a multiple of 8 (sublane tile)"
    scale = head_dim ** (-0.5)

    if block_b is None:
        block_b = _choose_block_b(B, N, num_heads, C)
    assert B % block_b == 0

    # Fold the softmax scale into the q columns of Wqkv (one-time, host side) and
    # hand bf16 weights to the kernel (native MXU rate, half the weight DMA).
    col_scale = jnp.concatenate([jnp.full((C,), scale, jnp.float32),
                                 jnp.ones((2 * C,), jnp.float32)])
    wqkv_bf16 = (wqkv_t.astype(jnp.float32) * col_scale[None, :]).astype(jnp.bfloat16)
    wproj_bf16 = wproj_t.astype(jnp.bfloat16)
    bproj2d = bproj.reshape(1, C).astype(jnp.float32)

    kernel = functools.partial(_attention_kernel, num_heads=num_heads)

    return pl.pallas_call(
        kernel,
        out_shape=jax.ShapeDtypeStruct((B, N, C), x.dtype),
        grid_spec=pltpu.PrefetchScalarGridSpec(
            num_scalar_prefetch=0,
            grid=(B // block_b,),
            in_specs=[
                pl.BlockSpec((block_b, N, C), lambda i: (i, 0, 0)),   # x (batch tile)
                pl.BlockSpec((C, 3 * C), lambda i: (0, 0)),           # Wqkv^T (scaled, bf16)
                pl.BlockSpec((C, C), lambda i: (0, 0)),               # Wproj^T (bf16)
                pl.BlockSpec((1, C), lambda i: (0, 0)),               # bproj (f32)
            ],
            out_specs=pl.BlockSpec((block_b, N, C), lambda i: (i, 0, 0)),
        ),
        compiler_params=pltpu.CompilerParams(
            dimension_semantics=("parallel",),
            # 48 MiB is safe on every generation (< v7x's 64 MiB physical VMEM,
            # above the 16/32 MiB scoped defaults on v5e/v6e); the tile chooser
            # keeps per-step intermediates at roughly half of it.
            vmem_limit_bytes=48 * 1024 * 1024,
        ),
    )(x, wqkv_bf16, wproj_bf16, bproj2d)


def attention_reference(x, wqkv_t, wproj_t, bproj, *, num_heads):
    """Pure-JAX f32 replica of the PyTorch forward (eval mode)."""
    B, N, C = x.shape
    head_dim = C // num_heads
    scale = head_dim ** (-0.5)

    qkv = x @ wqkv_t                                        # (B, N, 3C)
    qkv = qkv.reshape(B, N, 3, num_heads, head_dim)
    qkv = jnp.transpose(qkv, (2, 0, 3, 1, 4))               # (3, B, H, N, hd)
    q, k, v = qkv[0], qkv[1], qkv[2]
    attn = jnp.einsum('bhnd,bhmd->bhnm', q, k) * scale
    attn = jax.nn.softmax(attn, axis=-1)
    out = jnp.einsum('bhnm,bhmd->bhnd', attn, v)
    out = jnp.transpose(out, (0, 2, 1, 3)).reshape(B, N, C)
    return out @ wproj_t + bproj


if __name__ == "__main__":
    # Small, lane-friendly shapes consistent with the module:
    #   dim (C) = 128, num_heads = 8 -> head_dim = 16
    B, N, C = 2, 16, 128
    num_heads = 8

    key = jax.random.PRNGKey(0)
    kx, kq, kp, kb = jax.random.split(key, 4)

    x = jax.random.normal(kx, (B, N, C), dtype=jnp.float32)

    # Torch stores Linear weight as (out, in); pre-transpose to (in, out).
    wqkv = jax.random.normal(kq, (3 * C, C), dtype=jnp.float32) * 0.02
    wproj = jax.random.normal(kp, (C, C), dtype=jnp.float32) * 0.02
    bproj = jax.random.normal(kb, (C,), dtype=jnp.float32) * 0.02

    wqkv_t = wqkv.T        # (C, 3C)
    wproj_t = wproj.T      # (C, C)

    y = attention_pallas(x, wqkv_t, wproj_t, bproj, num_heads=num_heads)
    y = jax.block_until_ready(y)

    y_ref = attention_reference(x, wqkv_t, wproj_t, bproj, num_heads=num_heads)
    assert y.shape == (B, N, C)
    # bf16 MXU operands + approx reciprocal vs f32 reference -> loose tolerance.
    assert jnp.allclose(y, y_ref, atol=1e-2, rtol=1e-2), "mismatch vs reference"

    print("KERNEL_OK")
</pallas_src>

<mosaic_0001>
module attributes {stable_mosaic.version = 11 : i64} {
  func.func @_attention_kernel(%arg0: i32, %arg1: memref<1x16x128xf32, #tpu.memory_space<vmem>>, %arg2: memref<128x384xbf16, #tpu.memory_space<vmem>>, %arg3: memref<128x128xbf16, #tpu.memory_space<vmem>>, %arg4: memref<1x128xf32, #tpu.memory_space<vmem>>, %arg5: memref<1x16x128xf32, #tpu.memory_space<vmem>>) attributes {dimension_semantics = [#tpu.dimension_semantics<parallel>], iteration_bounds = array<i64: 2>, scalar_prefetch = 0 : i64, scratch_operands = 0 : i64, tpu.core_type = #tpu.core_type<tc>, window_params = [{transform_indices = @transform_0, window_bounds = array<i64: 1, 16, 128>}, {pipeline_mode = #tpu.pipeline_mode<synchronous>, transform_indices = @transform_1, window_bounds = array<i64: 128, 384>}, {pipeline_mode = #tpu.pipeline_mode<synchronous>, transform_indices = @transform_2, window_bounds = array<i64: 128, 128>}, {pipeline_mode = #tpu.pipeline_mode<synchronous>, transform_indices = @transform_3, window_bounds = array<i64: 1, 128>}, {transform_indices = @transform_4, window_bounds = array<i64: 1, 16, 128>}]} {
    %c0 = arith.constant 0 : index
    %c0_0 = arith.constant 0 : index
    %c0_1 = arith.constant 0 : index
    %0 = vector.load %arg1[%c0, %c0_0, %c0_1] : memref<1x16x128xf32, #tpu.memory_space<vmem>>, vector<1x16x128xf32>
    %1 = vector.shape_cast %0 : vector<1x16x128xf32> to vector<16x128xf32>
    %2 = arith.truncf %1 : vector<16x128xf32> to vector<16x128xbf16>
    %c0_2 = arith.constant 0 : index
    %c0_3 = arith.constant 0 : index
    %3 = vector.load %arg2[%c0_2, %c0_3] : memref<128x384xbf16, #tpu.memory_space<vmem>>, vector<128x384xbf16>
    %cst = arith.constant dense<0.000000e+00> : vector<16x384xf32>
    %4 = tpu.matmul %2, %3, %cst {dimension_numbers = #tpu.dot_dimension_numbers<[1], [0], [0], [1], [0, 0, 1, 1], [], []>} : vector<16x128xbf16>, vector<128x384xbf16>, vector<16x384xf32> -> vector<16x384xf32>
    %5 = vector.shape_cast %4 : vector<16x384xf32> to vector<1x16x384xf32>
    %6 = vector.extract_strided_slice %5 {offsets = [0, 0, 0], sizes = [1, 16, 16], strides = [1, 1, 1]} : vector<1x16x384xf32> to vector<1x16x16xf32>
    %7 = vector.extract_strided_slice %5 {offsets = [0, 0, 16], sizes = [1, 16, 16], strides = [1, 1, 1]} : vector<1x16x384xf32> to vector<1x16x16xf32>
    %8 = vector.extract_strided_slice %5 {offsets = [0, 0, 32], sizes = [1, 16, 16], strides = [1, 1, 1]} : vector<1x16x384xf32> to vector<1x16x16xf32>
    %9 = vector.extract_strided_slice %5 {offsets = [0, 0, 48], sizes = [1, 16, 16], strides = [1, 1, 1]} : vector<1x16x384xf32> to vector<1x16x16xf32>
    %10 = vector.extract_strided_slice %5 {offsets = [0, 0, 64], sizes = [1, 16, 16], strides = [1, 1, 1]} : vector<1x16x384xf32> to vector<1x16x16xf32>
    %11 = vector.extract_strided_slice %5 {offsets = [0, 0, 80], sizes = [1, 16, 16], strides = [1, 1, 1]} : vector<1x16x384xf32> to vector<1x16x16xf32>
    %12 = vector.extract_strided_slice %5 {offsets = [0, 0, 96], sizes = [1, 16, 16], strides = [1, 1, 1]} : vector<1x16x384xf32> to vector<1x16x16xf32>
    %13 = vector.extract_strided_slice %5 {offsets = [0, 0, 112], sizes = [1, 16, 16], strides = [1, 1, 1]} : vector<1x16x384xf32> to vector<1x16x16xf32>
    %14 = vector.shape_cast %6 : vector<1x16x16xf32> to vector<1x1x16x16xf32>
    %15 = vector.shape_cast %7 : vector<1x16x16xf32> to vector<1x1x16x16xf32>
    %16 = vector.shape_cast %8 : vector<1x16x16xf32> to vector<1x1x16x16xf32>
    %17 = vector.shape_cast %9 : vector<1x16x16xf32> to vector<1x1x16x16xf32>
    %18 = vector.shape_cast %10 : vector<1x16x16xf32> to vector<1x1x16x16xf32>
    %19 = vector.shape_cast %11 : vector<1x16x16xf32> to vector<1x1x16x16xf32>
    %20 = vector.shape_cast %12 : vector<1x16x16xf32> to vector<1x1x16x16xf32>
    %21 = vector.shape_cast %13 : vector<1x16x16xf32> to vector<1x1x16x16xf32>
    %22 = tpu.concatenate %14, %15, %16, %17, %18, %19, %20, %21 in 1 : vector<1x1x16x16xf32>, vector<1x1x16x16xf32>, vector<1x1x16x16xf32>, vector<1x1x16x16xf32>, vector<1x1x16x16xf32>, vector<1x1x16x16xf32>, vector<1x1x16x16xf32>, vector<1x1x16x16xf32> -> vector<1x8x16x16xf32>
    %23 = vector.shape_cast %22 : vector<1x8x16x16xf32> to vector<8x16x16xf32>
    %24 = arith.truncf %23 : vector<8x16x16xf32> to vector<8x16x16xbf16>
    %25 = vector.extract_strided_slice %5 {offsets = [0, 0, 128], sizes = [1, 16, 16], strides = [1, 1, 1]} : vector<1x16x384xf32> to vector<1x16x16xf32>
    %26 = vector.extract_strided_slice %5 {offsets = [0, 0, 144], sizes = [1, 16, 16], strides = [1, 1, 1]} : vector<1x16x384xf32> to vector<1x16x16xf32>
    %27 = vector.extract_strided_slice %5 {offsets = [0, 0, 160], sizes = [1, 16, 16], strides = [1, 1, 1]} : vector<1x16x384xf32> to vector<1x16x16xf32>
    %28 = vector.extract_strided_slice %5 {offsets = [0, 0, 176], sizes = [1, 16, 16], strides = [1, 1, 1]} : vector<1x16x384xf32> to vector<1x16x16xf32>
    %29 = vector.extract_strided_slice %5 {offsets = [0, 0, 192], sizes = [1, 16, 16], strides = [1, 1, 1]} : vector<1x16x384xf32> to vector<1x16x16xf32>
    %30 = vector.extract_strided_slice %5 {offsets = [0, 0, 208], sizes = [1, 16, 16], strides = [1, 1, 1]} : vector<1x16x384xf32> to vector<1x16x16xf32>
    %31 = vector.extract_strided_slice %5 {offsets = [0, 0, 224], sizes = [1, 16, 16], strides = [1, 1, 1]} : vector<1x16x384xf32> to vector<1x16x16xf32>
    %32 = vector.extract_strided_slice %5 {offsets = [0, 0, 240], sizes = [1, 16, 16], strides = [1, 1, 1]} : vector<1x16x384xf32> to vector<1x16x16xf32>
    %33 = vector.shape_cast %25 : vector<1x16x16xf32> to vector<1x1x16x16xf32>
    %34 = vector.shape_cast %26 : vector<1x16x16xf32> to vector<1x1x16x16xf32>
    %35 = vector.shape_cast %27 : vector<1x16x16xf32> to vector<1x1x16x16xf32>
    %36 = vector.shape_cast %28 : vector<1x16x16xf32> to vector<1x1x16x16xf32>
    %37 = vector.shape_cast %29 : vector<1x16x16xf32> to vector<1x1x16x16xf32>
    %38 = vector.shape_cast %30 : vector<1x16x16xf32> to vector<1x1x16x16xf32>
    %39 = vector.shape_cast %31 : vector<1x16x16xf32> to vector<1x1x16x16xf32>
    %40 = vector.shape_cast %32 : vector<1x16x16xf32> to vector<1x1x16x16xf32>
    %41 = tpu.concatenate %33, %34, %35, %36, %37, %38, %39, %40 in 1 : vector<1x1x16x16xf32>, vector<1x1x16x16xf32>, vector<1x1x16x16xf32>, vector<1x1x16x16xf32>, vector<1x1x16x16xf32>, vector<1x1x16x16xf32>, vector<1x1x16x16xf32>, vector<1x1x16x16xf32> -> vector<1x8x16x16xf32>
    %42 = vector.shape_cast %41 : vector<1x8x16x16xf32> to vector<8x16x16xf32>
    %43 = arith.truncf %42 : vector<8x16x16xf32> to vector<8x16x16xbf16>
    %44 = vector.extract_strided_slice %5 {offsets = [0, 0, 256], sizes = [1, 16, 16], strides = [1, 1, 1]} : vector<1x16x384xf32> to vector<1x16x16xf32>
    %45 = vector.extract_strided_slice %5 {offsets = [0, 0, 272], sizes = [1, 16, 16], strides = [1, 1, 1]} : vector<1x16x384xf32> to vector<1x16x16xf32>
    %46 = vector.extract_strided_slice %5 {offsets = [0, 0, 288], sizes = [1, 16, 16], strides = [1, 1, 1]} : vector<1x16x384xf32> to vector<1x16x16xf32>
    %47 = vector.extract_strided_slice %5 {offsets = [0, 0, 304], sizes = [1, 16, 16], strides = [1, 1, 1]} : vector<1x16x384xf32> to vector<1x16x16xf32>
    %48 = vector.extract_strided_slice %5 {offsets = [0, 0, 320], sizes = [1, 16, 16], strides = [1, 1, 1]} : vector<1x16x384xf32> to vector<1x16x16xf32>
    %49 = vector.extract_strided_slice %5 {offsets = [0, 0, 336], sizes = [1, 16, 16], strides = [1, 1, 1]} : vector<1x16x384xf32> to vector<1x16x16xf32>
    %50 = vector.extract_strided_slice %5 {offsets = [0, 0, 352], sizes = [1, 16, 16], strides = [1, 1, 1]} : vector<1x16x384xf32> to vector<1x16x16xf32>
    %51 = vector.extract_strided_slice %5 {offsets = [0, 0, 368], sizes = [1, 16, 16], strides = [1, 1, 1]} : vector<1x16x384xf32> to vector<1x16x16xf32>
    %52 = vector.shape_cast %44 : vector<1x16x16xf32> to vector<1x1x16x16xf32>
    %53 = vector.shape_cast %45 : vector<1x16x16xf32> to vector<1x1x16x16xf32>
    %54 = vector.shape_cast %46 : vector<1x16x16xf32> to vector<1x1x16x16xf32>
    %55 = vector.shape_cast %47 : vector<1x16x16xf32> to vector<1x1x16x16xf32>
    %56 = vector.shape_cast %48 : vector<1x16x16xf32> to vector<1x1x16x16xf32>
    %57 = vector.shape_cast %49 : vector<1x16x16xf32> to vector<1x1x16x16xf32>
    %58 = vector.shape_cast %50 : vector<1x16x16xf32> to vector<1x1x16x16xf32>
    %59 = vector.shape_cast %51 : vector<1x16x16xf32> to vector<1x1x16x16xf32>
    %60 = tpu.concatenate %52, %53, %54, %55, %56, %57, %58, %59 in 1 : vector<1x1x16x16xf32>, vector<1x1x16x16xf32>, vector<1x1x16x16xf32>, vector<1x1x16x16xf32>, vector<1x1x16x16xf32>, vector<1x1x16x16xf32>, vector<1x1x16x16xf32>, vector<1x1x16x16xf32> -> vector<1x8x16x16xf32>
    %61 = vector.shape_cast %60 : vector<1x8x16x16xf32> to vector<8x16x16xf32>
    %62 = arith.truncf %61 : vector<8x16x16xf32> to vector<8x16x16xbf16>
    "tpu.trace_start"() <{level = 10 : i32, message = "gnd,gmd->gnm"}> : () -> ()
    %cst_4 = arith.constant dense<0.000000e+00> : vector<8x16x16xf32>
    %63 = tpu.matmul %24, %43, %cst_4 {dimension_numbers = #tpu.dot_dimension_numbers<[2], [2], [1], [1], [0, 0, 0, 1, 1, 1], [0], [0]>} : vector<8x16x16xbf16>, vector<8x16x16xbf16>, vector<8x16x16xf32> -> vector<8x16x16xf32>
    "tpu.trace_stop"() : () -> ()
    %cst_5 = arith.constant dense<0xFF800000> : vector<8x16xf32>
    %64 = vector.multi_reduction <maximumf>, %63, %cst_5 [2] : vector<8x16x16xf32> to vector<8x16xf32>
    %65 = vector.shape_cast %64 : vector<8x16xf32> to vector<8x16x1xf32>
    %66 = vector.broadcast %65 : vector<8x16x1xf32> to vector<8x16x16xf32>
    %67 = arith.subf %63, %66 : vector<8x16x16xf32>
    %68 = math.exp %67 : vector<8x16x16xf32>
    %cst_6 = arith.constant dense<0.000000e+00> : vector<8x16xf32>
    %69 = vector.multi_reduction <add>, %68, %cst_6 [2] : vector<8x16x16xf32> to vector<8x16xf32>
    %70 = vector.shape_cast %69 : vector<8x16xf32> to vector<8x16x1xf32>
    %71 = tpu.reciprocal %70 {approx = true} : vector<8x16x1xf32> -> vector<8x16x1xf32>
    %72 = vector.broadcast %71 : vector<8x16x1xf32> to vector<8x16x16xf32>
    %73 = arith.mulf %68, %72 : vector<8x16x16xf32>
    %74 = arith.truncf %73 : vector<8x16x16xf32> to vector<8x16x16xbf16>
    "tpu.trace_start"() <{level = 10 : i32, message = "gmd,gnm->gdn"}> : () -> ()
    %cst_7 = arith.constant dense<0.000000e+00> : vector<8x16x16xf32>
    %75 = tpu.matmul %62, %74, %cst_7 {dimension_numbers = #tpu.dot_dimension_numbers<[1], [2], [2], [1], [0, 0, 0, 2, 1, 1], [0], [0]>} : vector<8x16x16xbf16>, vector<8x16x16xbf16>, vector<8x16x16xf32> -> vector<8x16x16xf32>
    "tpu.trace_stop"() : () -> ()
    %76 = vector.shape_cast %75 : vector<8x16x16xf32> to vector<1x128x16xf32>
    %77 = tpu.transpose %76, [0, 2, 1] : vector<1x128x16xf32> -> vector<1x16x128xf32>
    %78 = vector.shape_cast %77 : vector<1x16x128xf32> to vector<16x128xf32>
    %79 = arith.truncf %78 : vector<16x128xf32> to vector<16x128xbf16>
    %c0_8 = arith.constant 0 : index
    %c0_9 = arith.constant 0 : index
    %80 = vector.load %arg3[%c0_8, %c0_9] : memref<128x128xbf16, #tpu.memory_space<vmem>>, vector<128x128xbf16>
    %cst_10 = arith.constant dense<0.000000e+00> : vector<16x128xf32>
    %81 = tpu.matmul %79, %80, %cst_10 {dimension_numbers = #tpu.dot_dimension_numbers<[1], [0], [0], [1], [0, 0, 1, 1], [], []>} : vector<16x128xbf16>, vector<128x128xbf16>, vector<16x128xf32> -> vector<16x128xf32>
    %c0_11 = arith.constant 0 : index
    %c0_12 = arith.constant 0 : index
    %82 = vector.load %arg4[%c0_11, %c0_12] : memref<1x128xf32, #tpu.memory_space<vmem>>, vector<1x128xf32>
    %83 = vector.broadcast %82 : vector<1x128xf32> to vector<16x128xf32>
    %84 = arith.addf %81, %83 : vector<16x128xf32>
    %85 = vector.shape_cast %84 : vector<16x128xf32> to vector<1x16x128xf32>
    %c0_13 = arith.constant 0 : index
    %c0_14 = arith.constant 0 : index
    %c0_15 = arith.constant 0 : index
    %86 = vector.load %arg5[%c0_13, %c0_14, %c0_15] : memref<1x16x128xf32, #tpu.memory_space<vmem>>, vector<1x16x128xf32>
    tpu.vector_store %arg5[%c0_13, %c0_14, %c0_15], %85 {strides = array<i32>} : memref<1x16x128xf32, #tpu.memory_space<vmem>>, vector<1x16x128xf32>,
    return
  }
  func.func @transform_0(%arg0: i32) -> (i32, i32, i32) {
    %c0_i32 = arith.constant 0 : i32
    %c0_i32_0 = arith.constant 0 : i32
    %c0_i32_1 = arith.constant 0 : i32
    return %arg0, %c0_i32, %c0_i32_0 : i32, i32, i32
  }
  func.func @transform_1(%arg0: i32) -> (i32, i32) {
    %c0_i32 = arith.constant 0 : i32
    %c0_i32_0 = arith.constant 0 : i32
    %c0_i32_1 = arith.constant 0 : i32
    return %c0_i32, %c0_i32_0 : i32, i32
  }
  func.func @transform_2(%arg0: i32) -> (i32, i32) {
    %c0_i32 = arith.constant 0 : i32
    %c0_i32_0 = arith.constant 0 : i32
    %c0_i32_1 = arith.constant 0 : i32
    return %c0_i32, %c0_i32_0 : i32, i32
  }
  func.func @transform_3(%arg0: i32) -> (i32, i32) {
    %c0_i32 = arith.constant 0 : i32
    %c0_i32_0 = arith.constant 0 : i32
    %c0_i32_1 = arith.constant 0 : i32
    return %c0_i32, %c0_i32_0 : i32, i32
  }
  func.func @transform_4(%arg0: i32) -> (i32, i32, i32) {
    %c0_i32 = arith.constant 0 : i32
    %c0_i32_0 = arith.constant 0 : i32
    %c0_i32_1 = arith.constant 0 : i32
    return %arg0, %c0_i32, %c0_i32_0 : i32, i32, i32
  }
}

</mosaic_0001>

<bundles_post_ra>
// kernel: tpu_custom_call.1
= control target key start
LH: loop header
LB: loop body
LE: loop exit
PB: predicated region body
PF: predicated region fallthrough
CT: control target
= control target key end

     0   :  { %9 = vsyncpa [#allocation3], 0  ;;  %s3225_s0 = inlined_call_operand.hbm [shape: f32[2,16,128], index: 0, kind: input, shape index: {}]   ;;  %s3226_s1 = inlined_call_operand.hbm [shape: bf16[128,384], index: 1, kind: input, shape index: {}]   ;;  %s3227_s2 = inlined_call_operand.hbm [shape: bf16[128,128], index: 2, kind: input, shape index: {}]   ;;  %s3228_s3 = inlined_call_operand.vmem [shape: f32[1,128], index: 3, kind: input, shape index: {}]   ;;  %s3229_s4 = inlined_call_operand.hbm [shape: f32[2,16,128], index: 4, kind: output, shape index: {}]  }
   0x1   :  { %11 = vsyncpa [#allocation3 + $0x1], 0 }
   0x2   :  { %12 = vsyncpa [#allocation6], 0 }
   0x3   :  { %13 = vsyncpa [#allocation4], 0 }
   0x4   :  { %15 = vsyncpa [#allocation4 + $0x1], 0  ;;  %s2713_s15 = smov 0   ;;  %s2715_s16 = smov 0  }
   0x5   :  { %s2717_s17 = smov 0   ;;  %s2719_s18 = smov 0  }
   0x6 LB: > { %s2734_s19 = sadd.s32 4294967295, %s2664_s18   ;;  %s1967_s20 = sadd.s32 4294967294, %s2664_s18   ;;  %s2664_s18 = sphi %s2719_s18, %s3251_s18   ;;  %s2660_s17 = sphi %s2717_s17, %s3250_s17   ;;  %s2656_s16 = sphi %s2715_s16, %s3249_s16   ;;  %s2652_s15 = sphi %s2713_s15, %s3248_s15  }
   0x7   : > { %p41_p0 = scmp.ne.s32.totalorder %s2656_s16, %s2652_s15  ;;  %p3230_p1 = scmp.eq.s32.totalorder %s2734_s19, 0 }
   0x8   : > { %p134_p3 = scmp.eq.s32.totalorder %s1967_s20, 1  ;;  %p1968_p5 = scmp.ge.s32.totalorder %s2664_s18, 1 }
   0x9   : > { %p2743_p4 = por %p3230_p1, %p41_p0  ;;  %p141_p7 = scmp.lt.s32.totalorder %s2664_s18, 3 }
   0xa   : > { %p2748_p6 = por %p134_p3, %p41_p0  ;;  %s2666_s24 = smov [#allocation5]  }
   0xb   : > { %s3234_s21 = scalar_select %p2743_p4, 1, 0 }
   0xc   : > { %s3235_s22 = scalar_select %p2748_p6, 1, 0 }
   0xd   : > { %p2753_p8 = pnand %p1968_p5, %p141_p7  ;;  %s153_s25 = sshll.u32 %s2666_s24, 4  ;;  %s154_s25 = int_to_ptr.vmem [resolvable:$true] %s153_s25 }
   0xe   : > { %s2667_s27 = smov [#allocation7]   ;;  %s2527_s29 = scalar_lea.vmem %s154_s25, 3072 }
   0xf   : > { %s3236_s23 = scalar_select %p2753_p8, 1, 0 }
  0x10   : > { %p2234_p9 = pneg %p2753_p8  ;;  %s166_s28 = sshll.u32 %s2667_s27, 4  ;;  %s167_s28 = int_to_ptr.vmem [resolvable:$true] %s166_s28 }
  0x11   : > { %p2528_p13 = scmp.ne.s32.totalorder %s154_s25, %s2527_s29  ;;  %p2535_p5 = scmp.lt.s32.totalorder %s154_s25, %s154_s25 }
  0x12   : > { %p2762_p11 = pnand %p2234_p9, %p3230_p1  ;;  %p2536_p7 = scmp.lt.s32.totalorder %s2527_s29, %s2527_s29 }
  0x14   : > { %p2518_p12 = pneg %p2762_p11  ;;  %p2537_p10 = por %p2536_p7, %p2535_p5 }
  0x16   : > { %p2530_p0 = pnand %p2528_p13, %p2518_p12 }
  0x18   : > { %p2531_p3 = pneg %p2530_p0 }
  0x1a   : > { %p2538_p9 = pnand %p2537_p10, %p2531_p3 }
  0x1c   : > { %2541 = shalt.err (!%p2538_p9)
}
  0x1d   : > { %s2668_s30 = smov 192   ;;  %s2669_s5 = smov 12  }
  0x1e   : > { %2237 = dma.hbm_to_vmem [thread:$0]  (!%p2762_p11), %s3226_s1, 3072, %s154_s25, [#allocation6], %s2668_s30, %s2668_s30, %s2669_s5  }
  0x1f   : > { %s2553_s8 = scalar_lea.vmem %s167_s28, 1024  ;;  %p2561_p2 = scmp.lt.s32.totalorder %s167_s28, %s167_s28 }
  0x20   : > { %p2554_p1 = scmp.ne.s32.totalorder %s167_s28, %s2553_s8  ;;  %p2562_p6 = scmp.lt.s32.totalorder %s2553_s8, %s2553_s8 }
  0x22   : > { %p2556_p13 = pnand %p2554_p1, %p2518_p12  ;;  %p2563_p5 = por %p2562_p6, %p2561_p2 }
  0x24   : > { %p2557_p0 = pneg %p2556_p13 }
  0x26   : > { %p2564_p10 = pnand %p2563_p5, %p2557_p0 }
  0x28   : > { %2567 = shalt.err (!%p2564_p10)
}
  0x29   : > { %s2670_s9 = smov 64   ;;  %s2671_s10 = smov 4  }
  0x2a   : > { %2240 = dma.hbm_to_vmem [thread:$0]  (!%p2762_p11), %s3227_s2, 1024, %s167_s28, [#allocation6], %s2670_s9, %s2670_s9, %s2671_s10  }
  0x2b   : > { %s2785_s13 = sadd.s32 1, %s2664_s18   ;;  %s28_s20 = sadd.s32 1, %s2660_s17 }
  0x2c   : > { %s25_s14 = ssub.s32 %s2664_s18, %s2785_s13  ;;  %p35_p2 = scmp.ne.s32.totalorder %s2660_s17, %s2656_s16 }
  0x2d   : > { %p26_p1 = scmp.eq.s32.totalorder %s25_s14, 0  ;;  %p36_p6 = scmp.eq.s32.totalorder %s2664_s18, 0 }
  0x2e   : > { %p3238_p3 = scmp.eq.s32.totalorder %s2734_s19, 1  ;;  %p2251_p9 = scmp.lt.s32.totalorder %s2664_s18, 2 }
  0x2f   : > { %s2794_s24 = scalar_select %p26_p1, %s2660_s17, %s28_s20  }
  0x30   : > { %p37_p12 = por %p36_p6, %p35_p2  ;;  %p2798_p7 = por %p3238_p3, %p35_p2 }
  0x31   : > { %s183_s26 = sand.u32 1, %s2660_s17   ;;  %s2034_s28 = sshll.u32 %s2664_s18, 8 }
  0x32   : > { %s3239_s25 = scalar_select %p2798_p7, 1, 0 }
  0x33   : > { %s1972_s27 = sshll.u32 %s183_s26, 4  ;;  %s2808_s5 = scalar_lea.hbm %s3225_s0, %s2034_s28 }
  0x34   : > { %s187_s6 = scalar_lea.vmem [#allocation2], %s1972_s27  ;;  %p2812_p11 = pnand %p2251_p9, %p37_p12 }
  0x35   : > { %s194_s7 = sshll.u32 %s187_s6, 4  ;;  %s2816_s9 = scalar_lea.sflag [#allocation3], %s183_s26  ;;  %s2810_s7 = int_to_ptr.vmem [resolvable:$true] %s194_s7 }
  0x36   : > { %s2568_s10 = scalar_lea.hbm %s2808_s5, 256  ;;  %p2570_p0 = pneg %p2812_p11 }
  0x37   : > { %p2569_p13 = scmp.ne.s32.totalorder %s2808_s5, %s2568_s10  ;;  %s2573_s14 = scalar_lea.hbm %s3225_s0, 512 }
  0x38   : > { %p2574_p1 = scmp.lt.s32.totalorder %s2808_s5, %s3225_s0  ;;  %p2575_p2 = scmp.lt.s32.totalorder %s2573_s14, %s2568_s10 }
  0x39   : > { %p2571_p5 = pnand %p2570_p0, %p2569_p13 }
  0x3a   : > { %p2576_p6 = por %p2575_p2, %p2574_p1 }
  0x3b   : > { %p2572_p10 = pneg %p2571_p5 }
  0x3d   : > { %p2577_p12 = pnand %p2576_p6, %p2572_p10 }
  0x3f   : > { %2580 = shalt.err (!%p2577_p12)
}
  0x40   : > { %s2581_s26 = scalar_lea.vmem %s2810_s7, 256  ;;  %s2672_s28 = smov [#allocation2]  }
  0x41   : > { %p2582_p3 = scmp.ne.s32.totalorder %s2810_s7, %s2581_s26  ;;  %s2586_s29 = sshll.u32 %s2672_s28, 4  ;;  %s2587_s29 = int_to_ptr.vmem [resolvable:$false] %s2586_s29 }
  0x42   : > { %s2588_s30 = scalar_lea.vmem %s2587_s29, 512  ;;  %p2589_p5 = scmp.lt.s32.totalorder %s2810_s7, %s2587_s29 }
  0x43   : > { %p2584_p9 = pnand %p2582_p3, %p2570_p0  ;;  %p2590_p7 = scmp.lt.s32.totalorder %s2588_s30, %s2581_s26 }
  0x45   : > { %p2585_p13 = pneg %p2584_p9  ;;  %p2591_p4 = por %p2590_p7, %p2589_p5 }
  0x47   : > { %p2592_p8 = pnand %p2591_p4, %p2585_p13 }
  0x49   : > { %2595 = shalt.err (!%p2592_p8)
}
  0x4a   : > { %s2673_s6 = smov 128   ;;  %s2674_s10 = smov 8  }
  0x4b   : > { %2244 = dma.hbm_to_vmem [thread:$0]  (!%p2812_p11), %s2808_s5, 256, %s2810_s7, %s2816_s9, %s2673_s6, %s2673_s6, %s2674_s10  }
  0x4c   : > { %p3241_p0 = scmp.ne.s32.totalorder %s3236_s23, 0 }
  0x4d   : > { %s2840_s11 = sand.u32 (!%p3241_p0), 1, %s2656_s16   ;;  %p3242_p4 = scmp.ne.s32.totalorder (!%p3241_p0), %s3234_s21, 0 }
  0x4e   : > { %206 = sbr.rel (%p3241_p0) target bundleno = 1584 (0x630), region = 36  ;;  %s1976_s12 = sshll.u32 (!%p3241_p0), %s2840_s11, 4 }
  0x4f   : > { %s209_s14 = scalar_lea.sflag (!%p3241_p0), [#allocation3], %s2840_s11  ;;  %s2846_s20 = scalar_lea.vmem (!%p3241_p0), [#allocation2], %s1976_s12 }
  0x53   : > { %2639 = dma.done.wait (%p3242_p4), %s209_s14, 256  }
  0x54   : > { %2641 = vsyncadd (%p3242_p4), %s209_s14, 4294967040  ;;  %p3243_p8 = scmp.eq.s32.totalorder %s2734_s19, 0 }
  0x56   : > { %2643 = dma.done.wait (%p3243_p8), [#allocation6], 4096   ;;  %p3244_p7 = pmov %p3243_p8 }
  0x57   : > { %v2675_v0 = vmov 0   ;;  %v2676_v1 = vmov 0.0   ;;  %vm2677_vm0 = vmmov 0   ;;  %v2412_v2 = vld [vmem:[#allocation5 + $0xac] ss:$12 sps:$4 sm:$0xff]   ;;  %v246_v23 = vld [vmem:[%s2846_s20] sm:$0xff] }
  0x58   : > { %2645 = vsyncadd (%p3244_p7), [#allocation6], 4294963200  ;;  %441 = vmatprep.mubr.bf16.mxu0 %v2675_v0  ;;  %2086 = vmatprep.subr.bf16.mxu1 %v2676_v1  ;;  %v2414_v3 = vld [vmem:[#allocation5 + $0xa8] ss:$12 sps:$4 sm:$0xff]   ;;  %v2417_v5 = vld [vmem:[#allocation5 + $0x90] ss:$12 sps:$4 sm:$0xff]  }
  0x59   : > { %2102 = vmatprep.mubr.msk.bf16.mxu1 %vm2677_vm0, %v2676_v1  ;;  %409 = vmatprep.subr.bf16.mxu0 %v2412_v2  ;;  %v2415_v4 = vld [vmem:[#allocation5 + $0x94] ss:$12 sps:$4 sm:$0xff]   ;;  %v2418_v6 = vld [vmem:[#allocation5 + $0x7c] ss:$12 sps:$4 sm:$0xff]   ;;  %v2420_v7 = vld [vmem:[#allocation5 + $0x78] ss:$12 sps:$4 sm:$0xff]  }
  0x5a   : > { %410 = vmatpush1.bf16.msra.mxu0 %v2414_v3  ;;  %v2421_v8 = vld [vmem:[#allocation5 + $0x64] ss:$12 sps:$4 sm:$0xff]   ;;  %v2423_v9 = vld [vmem:[#allocation5 + $0x60] ss:$12 sps:$4 sm:$0xff]   ;;  %v2426_v13 = vld [vmem:[#allocation5 + $0x48] ss:$12 sps:$4 sm:$0xff]  }
  0x5b   : > { %411 = vmatprep.subr.bf16.mxu0 %v2415_v4  ;;  %v2424_v10 = vld [vmem:[#allocation5 + $0x4c] ss:$12 sps:$4 sm:$0xff]   ;;  %v2436_v11 = vld [vmem:[#allocation5 + $0xb0] ss:$12 sps:$4 sm:$0xff]   ;;  %v2427_v14 = vld [vmem:[#allocation5 + $0x34] ss:$12 sps:$4 sm:$0xff]  }
  0x5c   : > { %2087 = vmatpush3.bf16.msra.mxu1 %v2436_v11  ;;  %v2437_v12 = vld [vmem:[#allocation5 + $0x98] ss:$12 sps:$4 sm:$0xff]   ;;  %v2429_v15 = vld [vmem:[#allocation5 + $0x30] ss:$12 sps:$4 sm:$0xff]   ;;  %v2438_v16 = vld [vmem:[#allocation5 + $0x80] ss:$12 sps:$4 sm:$0xff]  }
  0x5d   : > { %2088 = vmatprep.subr.bf16.mxu1 %v2676_v1  ;;  %v2430_v17 = vld [vmem:[#allocation5 + $0x1c] ss:$12 sps:$4 sm:$0xff]   ;;  %v2432_v19 = vld [vmem:[#allocation5 + $0x18] ss:$12 sps:$4 sm:$0xff]   ;;  %v2435_v22 = vld [vmem:[#allocation5] ss:$12 sps:$4 sm:$0xff]  }
  0x5e   : > { %412 = vmatpush1.bf16.msra.mxu0 %v2417_v5  ;;  %v2439_v18 = vld [vmem:[#allocation5 + $0x68] ss:$12 sps:$4 sm:$0xff]   ;;  %v2433_v20 = vld [vmem:[#allocation5 + $0x4] ss:$12 sps:$4 sm:$0xff]   ;;  %v2442_v27 = vld [vmem:[#allocation5 + $0x20] ss:$12 sps:$4 sm:$0xff]  }
  0x5f   : > { %413 = vmatprep.subr.bf16.mxu0 %v2418_v6  ;;  %v2440_v21 = vld [vmem:[#allocation5 + $0x50] ss:$12 sps:$4 sm:$0xff]   ;;  %v2441_v26 = vld [vmem:[#allocation5 + $0x38] ss:$12 sps:$4 sm:$0xff]   ;;  %v2443_v28 = vld [vmem:[#allocation5 + $0x8] ss:$12 sps:$4 sm:$0xff]  }
  0x60   : > { %2089 = vmatpush3.bf16.msra.mxu1 %v2437_v12  ;;  %v247_v24 = vld [vmem:[%s2846_s20 + $0x8] sm:$0xff]  ;;  %vm649_vm1 = vcmask 130048   ;;  %s2678_s21 = smov 96   ;;  %s2679_s23 = smov 112  }
  0x61   : > { %2090 = vmatprep.subr.bf16.mxu1 %v2676_v1  ;;  %v248_v25 = vpack.c.bf16 %v247_v24, %v246_v23  ;;  %s2680_s5 = smov 64   ;;  %s2681_s7 = smov 80  }
  0x62   : > { %414 = vmatpush1.bf16.msra.mxu0 %v2420_v7  ;;  %s2682_s8 = smov 48   ;;  %s2683_s9 = smov 32  }
  0x63   : > { %415 = vmatprep.subr.bf16.mxu0 %v2421_v8  ;;  %s2684_s27 = smov 16   ;;  %s244_s29 = scalar_lea.vmem [#allocation8], %s1976_s12 }
  0x64   : > { %2091 = vmatpush3.bf16.msra.mxu1 %v2438_v16  ;;  %s1875_s30 = sshll.u32 %s244_s29, 4  ;;  %s2035_s6 = sshll.u32 %s2734_s19, 8  ;;  %s3177_s30 = int_to_ptr.vmem [resolvable:$true] %s1875_s30 }
  0x65   : > { %2092 = vmatprep.subr.bf16.mxu1 %v2676_v1  ;;  %s3182_s20 = scalar_lea.hbm %s3229_s4, %s2035_s6  ;;  %s1862_s12 = scalar_lea.sflag [#allocation4], %s2840_s11 }
  0x66   : > { %416 = vmatpush1.bf16.msra.mxu0 %v2423_v9  ;;  %p3245_p10 = scmp.ne.s32.totalorder %s3239_s25, 0  ;;  %s2685_s19 = smov [#allocation8]  }
  0x67   : > { %417 = vmatprep.subr.bf16.mxu0 %v2424_v10 }
  0x68   : > { %2093 = vmatpush3.bf16.msra.mxu1 %v2439_v18 }
  0x69   : > { %2094 = vmatprep.subr.bf16.mxu1 %v2676_v1 }
  0x6a   : > { %418 = vmatpush1.bf16.msra.mxu0 %v2426_v13 }
  0x6b   : > { %419 = vmatprep.subr.bf16.mxu0 %v2427_v14 }
  0x6c   : > { %2095 = vmatpush3.bf16.msra.mxu1 %v2440_v21 }
  0x6d   : > { %2096 = vmatprep.subr.bf16.mxu1 %v2676_v1 }
  0x6e   : > { %420 = vmatpush1.bf16.msra.mxu0 %v2429_v15 }
  0x6f   : > { %421 = vmatprep.subr.bf16.mxu0 %v2430_v17 }
  0x70   : > { %2097 = vmatpush3.bf16.msra.mxu1 %v2441_v26 }
  0x71   : > { %2098 = vmatprep.subr.bf16.mxu1 %v2676_v1 }
  0x72   : > { %422 = vmatpush1.bf16.msra.mxu0 %v2432_v19 }
  0x73   : > { %423 = vmatprep.subr.bf16.mxu0 %v2433_v20 }
  0x74   : > { %2099 = vmatpush3.bf16.msra.mxu1 %v2442_v27 }
  0x75   : > { %2100 = vmatprep.subr.bf16.mxu1 %v2676_v1 }
  0x76   : > { %424 = vmatpush1.bf16.msra.mxu0 %v2435_v22 }
  0x77   : > { %2130 = vmatprep.subr.bf16.mxu0 %v2676_v1 }
  0x78   : > { %2101 = vmatpush3.bf16.msra.mxu1 %v2443_v28 }
  0x79   : > { %442 = vmatmul.mubr.bf16.vlgmr.msra.gmra.mxu0 %v248_v25  ;;  %2106 = vmatprep.subr.bf16.mxu1 %v2676_v1 }
  0x7a   : > { %2132 = vmatprep.mubr.msk.bf16.mxu0 %vm2677_vm0, %v2676_v1 }
  0x7b   : > { %2103 = vmatmul.mubr.bf16.vlgmr.msra.gmra.mxu1 %v248_v25 }
  0x7c   : > { %2108 = vmatprep.mubr.msk.bf16.mxu1 %vm2677_vm0, %v2676_v1 }
 0x139   : > { %v443_v29 = vpop.f32.mrf.mxu0 }
 0x13b   : > { %v445_v30 = vpop.f32.mrf.mxu0  ;;  %v2891_v38 = vpop.f32.mrf.mxu1 }
 0x13d   : > { %v447_v31 = vpop.f32.mrf.mxu0  ;;  %v2104_v39 = vpop.f32.mrf.mxu1 }
 0x13e   : > { %v2322_v36 = vpack.i.bf16 %v447_v31, %v443_v29  ;;  %v537_v37 = vpack.c.bf16 %v447_v31, %v443_v29 }
 0x13f   : > { %v449_v32 = vpop.f32.mrf.mxu0  ;;  %v2893_v40 = vpop.f32.mrf.mxu1 }
 0x140   : > { %v2317_v33 = vpack.i.bf16 %v449_v32, %v445_v30  ;;  %v589_v34 = vpack.c.bf16 %v449_v32, %v445_v30  ;;  %v2897_v41 = vpack.i.bf16 %v2893_v40, %v2891_v38 }
 0x141   : > { %v2105_v42 = vpop.f32.mrf.mxu1 }
 0x142   : > { %2318 = vrot.lane.b32.xlu1 %v2317_v33, %s2678_s21  ;;  %2308 = vrot.lane.b32.xlu0 %v2317_v33, %s2679_s23  ;;  %v654_v35 = vsel %vm649_vm1, %v589_v34, 0 }
 0x143   : > { %2107 = vmatpush3.bf16.xpose.msra.mxu1 %v654_v35 }
 0x144   : > { %2112 = vmatprep.subr.bf16.mxu1 %v2676_v1 }
 0x146   : > { %2323 = vrot.lane.b32.xlu1 %v2322_v36, %s2678_s21  ;;  %2313 = vrot.lane.b32.xlu0 %v2322_v36, %s2679_s23 }
 0x14a   : > { %2348 = vrot.lane.b32.xlu1 %v2317_v33, %s2680_s5  ;;  %2328 = vrot.lane.b32.xlu0 %v2317_v33, %s2681_s7 }
 0x14b   : > { %2109 = vmatmul.mubr.msk.bf16.vlgmr.msra.gmra.mxu1 %vm649_vm1, %v537_v37 }
 0x14c   : > { %2114 = vmatprep.mubr.msk.bf16.mxu1 %vm2677_vm0, %v2676_v1 }
 0x14e   : > { %2353 = vrot.lane.b32.xlu1 %v2317_v33, %s2682_s8  ;;  %2333 = vrot.lane.b32.xlu0 %v2322_v36, %s2681_s7 }
 0x152   : > { %2358 = vrot.lane.b32.xlu1 %v2317_v33, %s2683_s9  ;;  %2338 = vrot.lane.b32.xlu0 %v2322_v36, %s2680_s5 }
 0x156   : > { %2363 = vrot.lane.b32.xlu1 %v2317_v33, %s2684_s27  ;;  %2343 = vrot.lane.b32.xlu0 %v2322_v36, %s2682_s8 }
 0x15a   : > { %2373 = vrot.lane.b32.xlu1 %v2322_v36, %s2684_s27  ;;  %2368 = vrot.lane.b32.xlu0 %v2322_v36, %s2683_s9 }
 0x15e   : > { %2378 = vrot.lane.b32.xlu0 %v2897_v41, %s2678_s21  ;;  %s2596_s21 = scalar_lea.vmem %s3177_s30, 256 }
 0x15f   : > { %p2597_p11 = scmp.ne.s32.totalorder %s3177_s30, %s2596_s21 }
 0x161   : > { %p2598_p1 = pnand %p2597_p11, %p3245_p10 }
 0x162   : > { %2383 = vrot.lane.b32.xlu0 %v2897_v41, %s2682_s8 }
 0x163   : > { %p2599_p2 = pneg %p2598_p1 }
 0x1b4   : > { %v2319_v43 = vpop.permute.xlu1 %2318  ;;  %v2309_v44 = vpop.permute.xlu0 %2308 }
 0x1b5   : > { %v2311_v45 = vunpack.i.h.bf16 %v2309_v44  ;;  %v2310_v46 = vunpack.i.l.bf16 %v2309_v44  ;;  %v2321_v50 = vunpack.i.h.bf16 %v2319_v43  ;;  %v2320_v51 = vunpack.i.l.bf16 %v2319_v43 }
 0x1b7   : > { %v590_v47 = vpack.c.bf16 %v2311_v45, %v2310_v46  ;;  %v591_v59 = vpack.c.bf16 %v2321_v50, %v2320_v51 }
 0x1b8   : > { %v2324_v48 = vpop.permute.xlu1 %2323  ;;  %v2314_v49 = vpop.permute.xlu0 %2313 }
 0x1b9   : > { %v701_v52 = vsel %vm649_vm1, %v590_v47, 0  ;;  %v2316_v53 = vunpack.i.h.bf16 %v2314_v49  ;;  %v2315_v54 = vunpack.i.l.bf16 %v2314_v49  ;;  %v748_v3 = vsel %vm649_vm1, %v591_v59, 0 }
 0x1ba   : > { %2113 = vmatpush3.bf16.xpose.msra.mxu1 %v701_v52  ;;  %v2326_v5 = vunpack.i.h.bf16 %v2324_v48  ;;  %v2325_v6 = vunpack.i.l.bf16 %v2324_v48 }
 0x1bb   : > { %2118 = vmatprep.subr.bf16.mxu1 %v2676_v1  ;;  %v538_v61 = vpack.c.bf16 %v2316_v53, %v2315_v54 }
 0x1bc   : > { %v2349_v55 = vpop.permute.xlu1 %2348  ;;  %v2329_v56 = vpop.permute.xlu0 %2328  ;;  %v539_v16 = vpack.c.bf16 %v2326_v5, %v2325_v6 }
 0x1bd   : > { %v2351_v57 = vunpack.i.h.bf16 %v2349_v55  ;;  %v2350_v58 = vunpack.i.l.bf16 %v2349_v55  ;;  %v2331_v0 = vunpack.i.h.bf16 %v2329_v56  ;;  %v2330_v2 = vunpack.i.l.bf16 %v2329_v56 }
 0x1bf   : > { %v593_v60 = vpack.c.bf16 %v2351_v57, %v2350_v58  ;;  %v592_v13 = vpack.c.bf16 %v2331_v0, %v2330_v2 }
 0x1c0   : > { %v2354_v62 = vpop.permute.xlu1 %2353  ;;  %v2334_v63 = vpop.permute.xlu0 %2333 }
 0x1c1   : > { %2115 = vmatmul.mubr.msk.bf16.vlgmr.msra.gmra.mxu1 %vm649_vm1, %v538_v61  ;;  %v842_v4 = vsel %vm649_vm1, %v593_v60, 0  ;;  %v2356_v18 = vunpack.i.h.bf16 %v2354_v62  ;;  %v2355_v19 = vunpack.i.l.bf16 %v2354_v62  ;;  %v795_v20 = vsel %vm649_vm1, %v592_v13, 0 }
 0x1c2   : > { %2119 = vmatpush3.bf16.xpose.msra.mxu1 %v748_v3  ;;  %2131 = vmatpush3.bf16.xpose.msra.mxu0 %v842_v4  ;;  %v2336_v22 = vunpack.i.h.bf16 %v2334_v63  ;;  %v2335_v23 = vunpack.i.l.bf16 %v2334_v63 }
 0x1c3   : > { %2120 = vmatprep.mubr.msk.bf16.mxu1 %vm2677_vm0, %v2676_v1  ;;  %2124 = vmatprep.subr.bf16.mxu1 %v2676_v1  ;;  %v594_v27 = vpack.c.bf16 %v2356_v18, %v2355_v19 }
 0x1c4   : > { %v2359_v7 = vpop.permute.xlu1 %2358  ;;  %v2339_v8 = vpop.permute.xlu0 %2338  ;;  %2142 = vmatprep.subr.bf16.mxu0 %v2676_v1  ;;  %v540_v30 = vpack.c.bf16 %v2336_v22, %v2335_v23 }
 0x1c5   : > { %v2361_v9 = vunpack.i.h.bf16 %v2359_v7  ;;  %v2360_v10 = vunpack.i.l.bf16 %v2359_v7  ;;  %v2341_v11 = vunpack.i.h.bf16 %v2339_v8  ;;  %v2340_v12 = vunpack.i.l.bf16 %v2339_v8 }
 0x1c6   : > { %v889_v33 = vsel %vm649_vm1, %v594_v27, 0 }
 0x1c7   : > { %v595_v14 = vpack.c.bf16 %v2361_v9, %v2360_v10  ;;  %v541_v15 = vpack.c.bf16 %v2341_v11, %v2340_v12 }
 0x1c8   : > { %v2344_v17 = vpop.permute.xlu0 %2343  ;;  %v2364_v28 = vpop.permute.xlu1 %2363 }
 0x1c9   : > { %2121 = vmatmul.mubr.msk.bf16.vlgmr.msra.gmra.mxu1 %vm649_vm1, %v539_v16  ;;  %2133 = vmatmul.mubr.msk.bf16.vlgmr.msra.gmra.mxu0 %vm649_vm1, %v541_v15  ;;  %v936_v21 = vsel %vm649_vm1, %v595_v14, 0  ;;  %v2366_v31 = vunpack.i.h.bf16 %v2364_v28  ;;  %v2365_v32 = vunpack.i.l.bf16 %v2364_v28  ;;  %v2346_v34 = vunpack.i.h.bf16 %v2344_v17 }
 0x1ca   : > { %2125 = vmatpush3.bf16.xpose.msra.mxu1 %v795_v20  ;;  %2143 = vmatpush3.bf16.xpose.msra.mxu0 %v936_v21  ;;  %v2345_v35 = vunpack.i.l.bf16 %v2344_v17 }
 0x1cb   : > { %2126 = vmatprep.mubr.msk.bf16.mxu1 %vm2677_vm0, %v2676_v1  ;;  %2144 = vmatprep.mubr.msk.bf16.mxu0 %vm2677_vm0, %v2676_v1  ;;  %v596_v36 = vpack.c.bf16 %v2366_v31, %v2365_v32 }
 0x1cc   : > { %v2369_v24 = vpop.permute.xlu0 %2368  ;;  %2136 = vmatprep.subr.bf16.mxu1 %v2676_v1  ;;  %2154 = vmatprep.subr.bf16.mxu0 %v2676_v1  ;;  %v542_v37 = vpack.c.bf16 %v2346_v34, %v2345_v35  ;;  %v2374_v39 = vpop.permute.xlu1 %2373  ;;  %v641_v34 = vpack.c.bf16 %v2893_v40, %v2891_v38 }
 0x1cd   : > { %v2371_v25 = vunpack.i.h.bf16 %v2369_v24  ;;  %v2370_v26 = vunpack.i.l.bf16 %v2369_v24  ;;  %v983_v42 = vsel %vm649_vm1, %v596_v36, 0  ;;  %v2376_v43 = vunpack.i.h.bf16 %v2374_v39 }
 0x1ce   : > { %v2375_v44 = vunpack.i.l.bf16 %v2374_v39 }
 0x1cf   : > { %v543_v29 = vpack.c.bf16 %v2371_v25, %v2370_v26 }
 0x1d0   : > { %v544_v45 = vpack.c.bf16 %v2376_v43, %v2375_v44  ;;  %v3010_v36 = vpop.permute.xlu0 %2378 }
 0x1d1   : > { %2127 = vmatmul.mubr.msk.bf16.vlgmr.msra.gmra.mxu1 %vm649_vm1, %v540_v30  ;;  %2145 = vmatmul.mubr.msk.bf16.vlgmr.msra.gmra.mxu0 %vm649_vm1, %v543_v29 }
 0x1d2   : > { %2137 = vmatpush3.bf16.xpose.msra.mxu1 %v889_v33  ;;  %2138 = vmatprep.mubr.msk.bf16.mxu1 %vm2677_vm0, %v2676_v1 }
 0x1d3   : > { %2148 = vmatprep.subr.bf16.mxu1 %v2676_v1  ;;  %2156 = vmatprep.mubr.msk.bf16.mxu0 %vm2677_vm0, %v2676_v1 }
 0x1d4   : > { %v3018_v39 = vpop.permute.xlu0 %2383 }
 0x1d9   : > { %2139 = vmatmul.mubr.msk.bf16.vlgmr.msra.gmra.mxu1 %vm649_vm1, %v542_v37 }
 0x1da   : > { %2149 = vmatpush3.bf16.xpose.msra.mxu1 %v983_v42  ;;  %2150 = vmatprep.mubr.msk.bf16.mxu1 %vm2677_vm0, %v2676_v1 }
 0x1db   : > { %2160 = vmatprep.subr.bf16.mxu1 %v2676_v1 }
 0x1e1   : > { %2151 = vmatmul.mubr.msk.bf16.vlgmr.msra.gmra.mxu1 %vm649_vm1, %v544_v45 }
 0x1e2   : > { %2162 = vmatprep.mubr.msk.bf16.mxu1 %vm2677_vm0, %v2676_v1 }
 0x20b   : > { %v2937_v46 = vpop.f32.mrf.mxu1 }
 0x20c   : > { %v1026_v47 = vsel %vm649_vm1, %v2937_v46, -inf }
 0x20d   : > { %1027 = vmax.xlane.f32.xlu0 %v1026_v47  ;;  %v2110_v48 = vpop.f32.mrf.mxu1 }
 0x20f   : > { %v2941_v49 = vpop.f32.mrf.mxu1 }
 0x210   : > { %v1029_v50 = vsel %vm649_vm1, %v2941_v49, -inf }
 0x211   : > { %1030 = vmax.xlane.f32.xlu1 %v1029_v50  ;;  %v2111_v51 = vpop.f32.mrf.mxu1 }
 0x281   : > { %v2945_v52 = vpop.f32.mrf.mxu1 }
 0x282   : > { %v1032_v53 = vsel %vm649_vm1, %v2945_v52, -inf }
 0x283   : > { %1033 = vmax.xlane.f32.xlu0 %v1032_v53  ;;  %v2116_v54 = vpop.f32.mrf.mxu1 }
 0x285   : > { %v2949_v55 = vpop.f32.mrf.mxu1 }
 0x286   : > { %v1035_v56 = vsel %vm649_vm1, %v2949_v55, -inf }
 0x287   : > { %1036 = vmax.xlane.f32.xlu0 %v1035_v56  ;;  %v2117_v57 = vpop.f32.mrf.mxu1 }
 0x289   : > { %v2953_v58 = vpop.f32.mrf.mxu1  ;;  %v2955_v59 = vpop.f32.mrf.mxu0 }
 0x28a   : > { %v1050_v60 = vsel %vm649_vm1, %v2955_v59, -inf  ;;  %v1038_v3 = vsel %vm649_vm1, %v2953_v58, -inf }
 0x28b   : > { %v2134_v61 = vpop.f32.mrf.mxu0  ;;  %1051 = vmax.xlane.f32.xlu1 %v1050_v60  ;;  %v2122_v62 = vpop.f32.mrf.mxu1 }
 0x28d   : > { %v2959_v63 = vpop.f32.mrf.mxu1  ;;  %v2961_v0 = vpop.f32.mrf.mxu0 }
 0x28e   : > { %v1053_v2 = vsel %vm649_vm1, %v2961_v0, -inf  ;;  %v1041_v9 = vsel %vm649_vm1, %v2959_v63, -inf }
 0x28f   : > { %v2135_v4 = vpop.f32.mrf.mxu0  ;;  %1054 = vmax.xlane.f32.xlu0 %v1053_v2  ;;  %1039 = vmax.xlane.f32.xlu1 %v1038_v3  ;;  %v2123_v5 = vpop.f32.mrf.mxu1 }
 0x291   : > { %v2967_v6 = vpop.f32.mrf.mxu1  ;;  %v2969_v7 = vpop.f32.mrf.mxu0 }
 0x292   : > { %v1062_v8 = vsel %vm649_vm1, %v2969_v7, -inf  ;;  %v1044_v15 = vsel %vm649_vm1, %v2967_v6, -inf }
 0x293   : > { %v2146_v10 = vpop.f32.mrf.mxu0  ;;  %1063 = vmax.xlane.f32.xlu1 %v1062_v8  ;;  %1042 = vmax.xlane.f32.xlu0 %v1041_v9  ;;  %v2128_v11 = vpop.f32.mrf.mxu1 }
 0x295   : > { %v2975_v12 = vpop.f32.mrf.mxu0  ;;  %v2977_v13 = vpop.f32.mrf.mxu1 }
 0x296   : > { %v1065_v14 = vsel %vm649_vm1, %v2975_v12, -inf  ;;  %v1047_v19 = vsel %vm649_vm1, %v2977_v13, -inf  ;;  %v1028_v38 = vpop.xlane.xlu0 %1027 }
 0x297   : > { %v2147_v16 = vpop.f32.mrf.mxu0  ;;  %1066 = vmax.xlane.f32.xlu0 %v1065_v14  ;;  %1045 = vmax.xlane.f32.xlu1 %v1044_v15  ;;  %v2129_v17 = vpop.f32.mrf.mxu1  ;;  %v1074_v40 = vsub.f32 %v2937_v46, %v1028_v38 }
 0x299   : > { %v2983_v18 = vpop.f32.mrf.mxu1  ;;  %v1090_v42 = vmul.f32 1.442695, %v1074_v40 }
 0x29a   : > { %v1056_v20 = vsel %vm649_vm1, %v2983_v18, -inf  ;;  %v1031_v31 = vpop.xlane.xlu1 %1030 }
 0x29b   : > { %1048 = vmax.xlane.f32.xlu0 %v1047_v19  ;;  %1057 = vmax.xlane.f32.xlu1 %v1056_v20  ;;  %v2140_v21 = vpop.f32.mrf.mxu1  ;;  %v1075_v32 = vsub.f32 %v2941_v49, %v1031_v31 }
 0x29d   : > { %v2989_v22 = vpop.f32.mrf.mxu1  ;;  %v1092_v33 = vmul.f32 1.442695, %v1075_v32 }
 0x29e   : > { %v1059_v23 = vsel %vm649_vm1, %v2989_v22, -inf }
 0x29f   : > { %1060 = vmax.xlane.f32.xlu0 %v1059_v23  ;;  %v2141_v24 = vpop.f32.mrf.mxu1  ;;  %2452 = vpow2.f32 %v1092_v33 }
 0x2a0   : > { %2454 = vpow2.f32 %v1090_v42 }
 0x2a1   : > { %v2993_v25 = vpop.f32.mrf.mxu1 }
 0x2a2   : > { %v1068_v26 = vsel %vm649_vm1, %v2993_v25, -inf }
 0x2a3   : > { %1069 = vmax.xlane.f32.xlu1 %v1068_v26  ;;  %v2152_v27 = vpop.f32.mrf.mxu1 }
 0x2a5   : > { %v2997_v28 = vpop.f32.mrf.mxu1 }
 0x2a6   : > { %v1071_v29 = vsel %vm649_vm1, %v2997_v28, -inf }
 0x2a7   : > { %1072 = vmax.xlane.f32.xlu0 %v1071_v29  ;;  %v2153_v30 = vpop.f32.mrf.mxu1 }
 0x2ac   : > { %v3008_v35 = vpop.eup %2452 }
 0x2ad   : > { %v1125_v37 = vsel %vm649_vm1, %v3008_v35, 0.0  ;;  %v3021_v43 = vpop.eup %2454 }
 0x2ae   : > { %v1122_v44 = vsel %vm649_vm1, %v3021_v43, 0.0 }
 0x2bd   : > { %2388 = vrot.lane.b32.xlu0 %v2897_v41, %s2684_s27 }
 0x2d0   : > { %1210 = vxpose.xlu1.c.b16.start.end [1/1] (short) (narrow) %v641_v34, 16 }
 0x2d4   : > { %2393 = vrot.lane.b32.xlu1 %v2897_v41, %s2679_s23  ;;  %s2600_s23 = sshll.u32 %s2685_s19, 4  ;;  %s2601_s23 = int_to_ptr.vmem [resolvable:$false] %s2600_s23 }
 0x2d5   : > { %p2603_p6 = scmp.lt.s32.totalorder %s3177_s30, %s2601_s23 }
 0x2d8   : > { %2398 = vrot.lane.b32.xlu1 %v2897_v41, %s2681_s7 }
 0x2dc   : > { %2403 = vrot.lane.b32.xlu1 %v2897_v41, %s2680_s5  ;;  %1126 = vadd.xlane.f32.xlu0 %v1125_v37  ;;  %s2602_s5 = scalar_lea.vmem %s2601_s23, 512 }
 0x2dd   : > { %p2604_p12 = scmp.lt.s32.totalorder %s2602_s5, %s2596_s21 }
 0x2df   : > { %p2605_p3 = por %p2604_p12, %p2603_p6 }
 0x2e1   : > { %p2606_p9 = pnand %p2605_p3, %p2599_p2 }
 0x300   : > { %1123 = vadd.xlane.f32.xlu1 %v1122_v44 }
 0x30c   : > { %v1034_v45 = vpop.xlane.xlu0 %1033 }
 0x30d   : > { %v1076_v47 = vsub.f32 %v2945_v52, %v1034_v45 }
 0x30f   : > { %v1094_v48 = vmul.f32 1.442695, %v1076_v47 }
 0x310   : > { %v1037_v49 = vpop.xlane.xlu0 %1036 }
 0x311   : > { %2456 = vpow2.f32 %v1094_v48  ;;  %v1077_v50 = vsub.f32 %v2949_v55, %v1037_v49 }
 0x313   : > { %v1096_v46 = vmul.f32 1.442695, %v1077_v50 }
 0x314   : > { %v1052_v51 = vpop.xlane.xlu1 %1051 }
 0x315   : > { %v1082_v53 = vsub.f32 %v2955_v59, %v1052_v51 }
 0x317   : > { %v1106_v54 = vmul.f32 1.442695, %v1082_v53  ;;  %v2381_v53 = vunpack.i.h.bf16 %v3010_v36 }
 0x318   : > { %v1055_v56 = vpop.xlane.xlu0 %1054  ;;  %v1040_v57 = vpop.xlane.xlu1 %1039 }
 0x319   : > { %2458 = vpow2.f32 %v1106_v54  ;;  %v1083_v60 = vsub.f32 %v2961_v0, %v1055_v56  ;;  %v1078_v61 = vsub.f32 %v2953_v58, %v1040_v57 }
 0x31a   : > { %2460 = vpow2.f32 %v1096_v46  ;;  %v2380_v46 = vunpack.i.l.bf16 %v3010_v36 }
 0x31b   : > { %v1108_v62 = vmul.f32 1.442695, %v1083_v60  ;;  %v1098_v52 = vmul.f32 1.442695, %v1078_v61 }
 0x31c   : > { %v1064_v2 = vpop.xlane.xlu1 %1063  ;;  %v1043_v3 = vpop.xlane.xlu0 %1042  ;;  %v643_v54 = vpack.c.bf16 %v2381_v53, %v2380_v46 }
 0x31d   : > { %2462 = vpow2.f32 %v1108_v62  ;;  %v1086_v55 = vsub.f32 %v2969_v7, %v1064_v2  ;;  %v1079_v4 = vsub.f32 %v2959_v63, %v1043_v3 }
 0x31e   : > { %v3032_v59 = vpop.eup %2456  ;;  %2464 = vpow2.f32 %v1098_v52 }
 0x31f   : > { %v1114_v5 = vmul.f32 1.442695, %v1086_v55  ;;  %v1100_v8 = vmul.f32 1.442695, %v1079_v4  ;;  %v1128_v0 = vsel %vm649_vm1, %v3032_v59, 0.0 }
 0x320   : > { %v3036_v9 = vpop.xlane.xlu0 %1066  ;;  %v1046_v58 = vpop.xlane.xlu1 %1045  ;;  %1129 = vadd.xlane.f32.xlu0 %v1128_v0 }
 0x321   : > { %2466 = vpow2.f32 %v1114_v5  ;;  %v1080_v10 = vsub.f32 %v2967_v6, %v1046_v58  ;;  %v1087_v62 = vsub.f32 %v2975_v12, %v3036_v9 }
 0x322   : > { %2468 = vpow2.f32 %v1100_v8 }
 0x323   : > { %v1102_v11 = vmul.f32 1.442695, %v1080_v10  ;;  %v1116_v2 = vmul.f32 1.442695, %v1087_v62 }
 0x324   : > { %v1049_v7 = vpop.xlane.xlu0 %1048  ;;  %v1058_v14 = vpop.xlane.xlu1 %1057 }
 0x325   : > { %v1081_v63 = vsub.f32 %v2977_v13, %v1049_v7  ;;  %2470 = vpow2.f32 %v1102_v11  ;;  %v1084_v17 = vsub.f32 %v2983_v18, %v1058_v14 }
 0x326   : > { %v3040_v15 = vpop.eup %2458 }
 0x327   : > { %v1104_v16 = vmul.f32 1.442695, %v1081_v63  ;;  %v1146_v19 = vsel %vm649_vm1, %v3040_v15, 0.0  ;;  %v3045_v20 = vpop.eup %2460  ;;  %v1110_v13 = vmul.f32 1.442695, %v1084_v17 }
 0x328   : > { %1147 = vadd.xlane.f32.xlu0 %v1146_v19  ;;  %v1061_v21 = vpop.xlane.xlu0 %1060  ;;  %v1131_v26 = vsel %vm649_vm1, %v3045_v20, 0.0 }
 0x329   : > { %v1085_v23 = vsub.f32 %v2989_v22, %v1061_v21  ;;  %2472 = vpow2.f32 %v1104_v16 }
 0x32a   : > { %v3047_v6 = vpop.eup %2462 }
 0x32b   : > { %v1149_v24 = vsel %vm649_vm1, %v3047_v6, 0.0  ;;  %v3054_v18 = vpop.eup %2464  ;;  %v1112_v27 = vmul.f32 1.442695, %v1085_v23 }
 0x32c   : > { %1150 = vadd.xlane.f32.xlu1 %v1149_v24  ;;  %1132 = vadd.xlane.f32.xlu0 %v1131_v26  ;;  %v1070_v29 = vpop.xlane.xlu1 %1069  ;;  %v1134_v22 = vsel %vm649_vm1, %v3054_v18, 0.0 }
 0x32d   : > { %2474 = vpow2.f32 %v1112_v27  ;;  %v1088_v31 = vsub.f32 %v2993_v25, %v1070_v29 }
 0x32e   : > { %v3056_v30 = vpop.eup %2466  ;;  %2476 = vpow2.f32 %v1110_v13 }
 0x32f   : > { %v1158_v32 = vsel %vm649_vm1, %v3056_v30, 0.0  ;;  %v3063_v33 = vpop.eup %2468  ;;  %v1118_v34 = vmul.f32 1.442695, %v1088_v31 }
 0x330   : > { %1135 = vadd.xlane.f32.xlu1 %v1134_v22  ;;  %1159 = vadd.xlane.f32.xlu0 %v1158_v32  ;;  %v1137_v37 = vsel %vm649_vm1, %v3063_v33, 0.0  ;;  %v1073_v52 = vpop.xlane.xlu0 %1072 }
 0x331   : > { %2478 = vpow2.f32 %v1118_v34  ;;  %v1089_v3 = vsub.f32 %v2997_v28, %v1073_v52  ;;  %v2386_v34 = vunpack.i.h.bf16 %v3018_v39 }
 0x332   : > { %v3067_v38 = vpop.eup %2470  ;;  %v1218_v51 = vpop.trf.xlu1  ;;  %2480 = vpow2.f32 %v1116_v2 }
 0x333   : > { %v1140_v25 = vsel %vm649_vm1, %v3067_v38, 0.0  ;;  %v1120_v36 = vmul.f32 1.442695, %v1089_v3 }
 0x334   : > { %1138 = vadd.xlane.f32.xlu0 %v1137_v37  ;;  %v3094_v4 = vpop.permute.xlu0 %2388  ;;  %v2385_v37 = vunpack.i.l.bf16 %v3018_v39 }
 0x335   : > { %2482 = vpow2.f32 %v1120_v36  ;;  %v2391_v46 = vunpack.i.h.bf16 %v3094_v4 }
 0x336   : > { %v3071_v40 = vpop.eup %2472  ;;  %v646_v39 = vpack.c.bf16 %v2386_v34, %v2385_v37 }
 0x337   : > { %v1143_v44 = vsel %vm649_vm1, %v3071_v40, 0.0 }
 0x338   : > { %1141 = vadd.xlane.f32.xlu0 %v1140_v25 }
 0x33a   : > { %v3073_v42 = vpop.eup %2474 }
 0x33b   : > { %v3077_v45 = vpop.eup %2476  ;;  %v1155_v47 = vsel %vm649_vm1, %v3073_v42, 0.0 }
 0x33c   : > { %1144 = vadd.xlane.f32.xlu0 %v1143_v44  ;;  %1156 = vadd.xlane.f32.xlu1 %v1155_v47  ;;  %v1152_v48 = vsel %vm649_vm1, %v3077_v45, 0.0 }
 0x33e   : > { %v3083_v49 = vpop.eup %2478 }
 0x33f   : > { %v1164_v50 = vsel %vm649_vm1, %v3083_v49, 0.0 }
 0x340   : > { %1153 = vadd.xlane.f32.xlu0 %v1152_v48 }
 0x344   : > { %1165 = vadd.xlane.f32.xlu0 %v1164_v50 }
 0x346   : > { %v2394_v56 = vpop.permute.xlu1 %2393 }
 0x347   : > { %v2396_v57 = vunpack.i.h.bf16 %v2394_v56  ;;  %v2395_v60 = vunpack.i.l.bf16 %v2394_v56 }
 0x349   : > { %v642_v61 = vpack.c.bf16 %v2396_v57, %v2395_v60 }
 0x34a   : > { %v2399_v55 = vpop.permute.xlu1 %2398 }
 0x34b   : > { %v2400_v13 = vunpack.i.l.bf16 %v2399_v55 }
 0x34e   : > { %v2404_v5 = vpop.permute.xlu1 %2403 }
 0x34f   : > { %v2406_v27 = vunpack.i.h.bf16 %v2404_v5  ;;  %v2405_v29 = vunpack.i.l.bf16 %v2404_v5 }
 0x351   : > { %v645_v44 = vpack.c.bf16 %v2406_v27, %v2405_v29 }
 0x365   : > { %v1127_v8 = vpop.xlane.xlu0 %1126 }
 0x366   : > { %2484 = vrcp.f32 %v1127_v8 }
 0x369   : > { %1336 = vxpose.xlu1.c.b16.start.end [1/1] (short) (narrow) %v643_v54, 16  ;;  %v2390_v54 = vunpack.i.l.bf16 %v3094_v4 }
 0x36b   : > { %v648_v62 = vpack.c.bf16 %v2391_v46, %v2390_v54 }
 0x36d   : > { %2408 = vrot.lane.b32.xlu1 %v2897_v41, %s2683_s9  ;;  %v3096_v41 = vpop.eup %2480 }
 0x36e   : > { %v1161_v12 = vsel %vm649_vm1, %v3096_v41, 0.0  ;;  %v3100_v9 = vpop.eup %2482 }
 0x36f   : > { %v1167_v28 = vsel %vm649_vm1, %v3100_v9, 0.0 }
 0x371   : > { %1273 = vxpose.xlu0.c.b16.start.end [1/1] (short) (narrow) %v642_v61, 16 }
 0x373   : > { %v2485_v58 = vpop.eup %2484 }
 0x374   : > { %v1187_v7 = vmul.f32 %v2485_v58, %v3008_v35  ;;  %v2401_v35 = vunpack.i.h.bf16 %v2399_v55 }
 0x376   : > { %v644_v26 = vpack.c.bf16 %v2401_v35, %v2400_v13 }
 0x389   : > { %v1124_v0 = vpop.xlane.xlu1 %1123 }
 0x38a   : > { %2486 = vrcp.f32 %v1124_v0 }
 0x391   : > { %1162 = vadd.xlane.f32.xlu1 %v1161_v12 }
 0x395   : > { %1168 = vadd.xlane.f32.xlu1 %v1167_v28 }
 0x397   : > { %v2487_v10 = vpop.eup %2486 }
 0x398   : > { %v1186_v11 = vmul.f32 %v2487_v10, %v3021_v43 }
 0x39a   : > { %v1202_v63 = vpack.c.bf16 %v1187_v7, %v1186_v11 }
 0x39c   : > { %v1230_v14 = vsel %vm649_vm1, %v1202_v63, 0 }
 0x39d   : > { %2155 = vmatpush3.bf16.xpose.msra.mxu0 %v1230_v14 }
 0x39e   : > { %2166 = vmatprep.subr.bf16.mxu0 %v2676_v1 }
 0x3a4   : > { %2157 = vmatmul.mubr.msk.bf16.vlgmr.msra.gmra.mxu0 %vm649_vm1, %v1218_v51 }
 0x3a5   : > { %2168 = vmatprep.mubr.msk.bf16.mxu0 %vm2677_vm0, %v2676_v1 }
 0x3a9   : > { %v1130_v16 = vpop.xlane.xlu0 %1129 }
 0x3aa   : > { %2488 = vrcp.f32 %v1130_v16 }
 0x3b1   : > { %v1148_v17 = vpop.xlane.xlu0 %1147 }
 0x3b5   : > { %v1151_v19 = vpop.xlane.xlu1 %1150  ;;  %v1133_v21 = vpop.xlane.xlu0 %1132 }
 0x3b6   : > { %2490 = vrcp.f32 %v1133_v21 }
 0x3b7   : > { %v2489_v22 = vpop.eup %2488 }
 0x3b8   : > { %v1188_v47 = vmul.f32 %v2489_v22, %v3032_v59 }
 0x3b9   : > { %v1136_v43 = vpop.xlane.xlu1 %1135  ;;  %v3111_v23 = vpop.xlane.xlu0 %1159 }
 0x3ba   : > { %2492 = vrcp.f32 %v1136_v43 }
 0x3bd   : > { %v1139_v24 = vpop.xlane.xlu0 %1138 }
 0x3be   : > { %2494 = vrcp.f32 %v1139_v24 }
 0x3bf   : > { %2496 = vrcp.f32 %v1151_v19 }
 0x3c0   : > { %2498 = vrcp.f32 %v1148_v17 }
 0x3c1   : > { %v1142_v31 = vpop.xlane.xlu0 %1141 }
 0x3c2   : > { %1399 = vxpose.xlu1.c.b16.start.end [1/1] (short) (narrow) %v644_v26, 16  ;;  %2500 = vrcp.f32 %v1142_v31 }
 0x3c3   : > { %v2491_v32 = vpop.eup %2490 }
 0x3c4   : > { %v1189_v48 = vmul.f32 %v2491_v32, %v3045_v20 }
 0x3c5   : > { %v1145_v25 = vpop.xlane.xlu0 %1144  ;;  %v1157_v50 = vpop.xlane.xlu1 %1156 }
 0x3c6   : > { %2502 = vrcp.f32 %v1145_v25  ;;  %1462 = vxpose.xlu1.c.b16.start.end [1/1] (short) (narrow) %v645_v44, 16  ;;  %v1203_v51 = vpack.c.bf16 %v1189_v48, %v1188_v47 }
 0x3c7   : > { %2504 = vrcp.f32 %v1157_v50  ;;  %v2493_v53 = vpop.eup %2492  ;;  %v2444_v50 = vld [vmem:[#allocation7 + $0x38] sm:$0xff]  }
 0x3c8   : > { %v1293_v56 = vsel %vm649_vm1, %v1203_v51, 0  ;;  %v1190_v59 = vmul.f32 %v2493_v53, %v3054_v18  ;;  %v2445_v53 = vld [vmem:[#allocation7 + $0x30] sm:$0xff]  }
 0x3c9   : > { %v1154_v57 = vpop.xlane.xlu0 %1153  ;;  %2161 = vmatpush3.bf16.xpose.msra.mxu1 %v1293_v56 }
 0x3ca   : > { %2506 = vrcp.f32 %v1154_v57  ;;  %1525 = vxpose.xlu1.c.b16.start.end [1/1] (short) (narrow) %v646_v39, 16  ;;  %2172 = vmatprep.subr.bf16.mxu1 %v2676_v1  ;;  %v2446_v39 = vld [vmem:[#allocation7 + $0x28] sm:$0xff]  }
 0x3cb   : > { %v2495_v60 = vpop.eup %2494  ;;  %v1344_v58 = vpop.trf.xlu1  ;;  %2508 = vrcp.f32 %v3111_v23 }
 0x3cc   : > { %v1191_v20 = vmul.f32 %v2495_v60, %v3063_v33  ;;  %v2497_v61 = vpop.eup %2496 }
 0x3cd   : > { %v2499_v2 = vpop.eup %2498  ;;  %v1166_v3 = vpop.xlane.xlu0 %1165  ;;  %v1195_v36 = vmul.f32 %v2497_v61, %v3047_v6  ;;  %v2448_v61 = vld [vmem:[#allocation7 + $0x18] sm:$0xff]  }
 0x3ce   : > { %v1204_v52 = vpack.c.bf16 %v1191_v20, %v1190_v59  ;;  %1651 = vxpose.xlu1.c.b16.start.end [1/1] (short) (narrow) %v648_v62, 16  ;;  %v1194_v5 = vmul.f32 %v2499_v2, %v3040_v15  ;;  %v2447_v20 = vld [vmem:[#allocation7 + $0x20] sm:$0xff]   ;;  %v2449_v62 = vld [vmem:[#allocation7 + $0x10] sm:$0xff]  }
 0x3cf   : > { %v2501_v4 = vpop.eup %2500  ;;  %v2451_v2 = vld [vmem:[#allocation7] sm:$0xff]  }
 0x3d0   : > { %v1356_v55 = vsel %vm649_vm1, %v1204_v52, 0  ;;  %v1192_v33 = vmul.f32 %v2501_v4, %v3067_v38  ;;  %v1206_v12 = vpack.c.bf16 %v1195_v36, %v1194_v5  ;;  %v2450_v52 = vld [vmem:[#allocation7 + $0x8] sm:$0xff]  }
 0x3d1   : > { %2167 = vmatpush3.bf16.xpose.msra.mxu0 %v1356_v55 }
 0x3d2   : > { %2178 = vmatprep.subr.bf16.mxu0 %v2676_v1  ;;  %v1482_v11 = vsel %vm649_vm1, %v1206_v12, 0 }
 0x3d3   : > { %v2503_v8 = vpop.eup %2502  ;;  %v1281_v18 = vpop.trf.xlu0 }
 0x3d4   : > { %2163 = vmatmul.mubr.msk.bf16.vlgmr.msra.gmra.mxu1 %vm649_vm1, %v1281_v18  ;;  %v1193_v0 = vmul.f32 %v2503_v8, %v3071_v40  ;;  %v2505_v28 = vpop.eup %2504 }
 0x3d5   : > { %2174 = vmatprep.mubr.msk.bf16.mxu1 %vm2677_vm0, %v2676_v1  ;;  %v1197_v38 = vmul.f32 %v2505_v28, %v3073_v42 }
 0x3d6   : > { %v1205_v6 = vpack.c.bf16 %v1193_v0, %v1192_v33 }
 0x3d7   : > { %v2507_v10 = vpop.eup %2506 }
 0x3d8   : > { %2169 = vmatmul.mubr.msk.bf16.vlgmr.msra.gmra.mxu0 %vm649_vm1, %v1344_v58  ;;  %v1419_v15 = vsel %vm649_vm1, %v1205_v6, 0  ;;  %v1196_v7 = vmul.f32 %v2507_v10, %v3077_v45  ;;  %v2509_v43 = vpop.eup %2508 }
 0x3d9   : > { %2173 = vmatpush3.bf16.xpose.msra.mxu1 %v1419_v15  ;;  %2179 = vmatpush3.bf16.xpose.msra.mxu0 %v1482_v11  ;;  %v1198_v23 = vmul.f32 %v2509_v43, %v3056_v30 }
 0x3da   : > { %2184 = vmatprep.subr.bf16.mxu1 %v2676_v1  ;;  %v1207_v40 = vpack.c.bf16 %v1197_v38, %v1196_v7  ;;  %2180 = vmatprep.mubr.msk.bf16.mxu0 %vm2677_vm0, %v2676_v1 }
 0x3db   : > { %2190 = vmatprep.subr.bf16.mxu0 %v2676_v1 }
 0x3dc   : > { %v1545_v21 = vsel %vm649_vm1, %v1207_v40, 0 }
 0x3df   : > { %v2409_v63 = vpop.permute.xlu1 %2408 }
 0x3e0   : > { %v2411_v14 = vunpack.i.h.bf16 %v2409_v63  ;;  %v2410_v16 = vunpack.i.l.bf16 %v2409_v63 }
 0x3e2   : > { %v647_v17 = vpack.c.bf16 %v2411_v14, %v2410_v16 }
 0x3e4   : > { %1588 = vxpose.xlu0.c.b16.start.end [1/1] (short) (narrow) %v647_v17, 16  ;;  %v2020_v17 = vld [vmem:[%s3228_s3] ss:$0 sm:$0xff] }
 0x41a   : > { %v1163_v45 = vpop.xlane.xlu1 %1162 }
 0x41b   : > { %2510 = vrcp.f32 %v1163_v45 }
 0x41c   : > { %2512 = vrcp.f32 %v1166_v3 }
 0x41e   : > { %v1169_v42 = vpop.xlane.xlu1 %1168 }
 0x41f   : > { %2514 = vrcp.f32 %v1169_v42 }
 0x424   : > { %v1407_v19 = vpop.trf.xlu1 }
 0x425   : > { %2175 = vmatmul.mubr.msk.bf16.vlgmr.msra.gmra.mxu1 %vm649_vm1, %v1407_v19 }
 0x426   : > { %2185 = vmatpush3.bf16.xpose.msra.mxu1 %v1545_v21  ;;  %2186 = vmatprep.mubr.msk.bf16.mxu1 %vm2677_vm0, %v2676_v1 }
 0x427   : > { %2196 = vmatprep.subr.bf16.mxu1 %v2676_v1 }
 0x428   : > { %v2511_v35 = vpop.eup %2510  ;;  %v1470_v13 = vpop.trf.xlu1 }
 0x429   : > { %2181 = vmatmul.mubr.msk.bf16.vlgmr.msra.gmra.mxu0 %vm649_vm1, %v1470_v13  ;;  %v1199_v24 = vmul.f32 %v2511_v35, %v3096_v41  ;;  %v2513_v26 = vpop.eup %2512 }
 0x42a   : > { %2192 = vmatprep.mubr.msk.bf16.mxu0 %vm2677_vm0, %v2676_v1  ;;  %v1200_v32 = vmul.f32 %v2513_v26, %v3083_v49 }
 0x42b   : > { %v1208_v27 = vpack.c.bf16 %v1199_v24, %v1198_v23 }
 0x42c   : > { %v2515_v29 = vpop.eup %2514  ;;  %v1533_v31 = vpop.trf.xlu1 }
 0x42d   : > { %v1608_v22 = vsel %vm649_vm1, %v1208_v27, 0  ;;  %2187 = vmatmul.mubr.msk.bf16.vlgmr.msra.gmra.mxu1 %vm649_vm1, %v1533_v31  ;;  %v1201_v34 = vmul.f32 %v2515_v29, %v3100_v9 }
 0x42e   : > { %2191 = vmatpush3.bf16.xpose.msra.mxu0 %v1608_v22  ;;  %2198 = vmatprep.mubr.msk.bf16.mxu1 %vm2677_vm0, %v2676_v1 }
 0x42f   : > { %v1209_v30 = vpack.c.bf16 %v1201_v34, %v1200_v32  ;;  %2202 = vmatprep.subr.bf16.mxu0 %v2676_v1 }
 0x430   : > { %v1659_v37 = vpop.trf.xlu1 }
 0x431   : > { %v1671_v41 = vsel %vm649_vm1, %v1209_v30, 0 }
 0x432   : > { %2197 = vmatpush3.bf16.xpose.msra.mxu1 %v1671_v41 }
 0x439   : > { %2199 = vmatmul.mubr.msk.bf16.vlgmr.msra.gmra.mxu1 %vm649_vm1, %v1659_v37 }
 0x446   : > { %v1596_v25 = vpop.trf.xlu0 }
 0x447   : > { %2193 = vmatmul.mubr.msk.bf16.vlgmr.msra.gmra.mxu0 %vm649_vm1, %v1596_v25 }
 0x448   : > { %2218 = vmatprep.mubr.msk.bf16.mxu0 %vm2677_vm0, %v2676_v1  ;;  %2203 = vmatpush3.bf16.msra.mxu0 %v2444_v50 }
 0x449   : > { %2204 = vmatprep.subr.bf16.mxu0 %v2676_v1 }
 0x44c   : > { %2205 = vmatpush3.bf16.msra.mxu0 %v2445_v53 }
 0x44d   : > { %2206 = vmatprep.subr.bf16.mxu0 %v2676_v1 }
 0x450   : > { %2207 = vmatpush3.bf16.msra.mxu0 %v2446_v39 }
 0x451   : > { %2208 = vmatprep.subr.bf16.mxu0 %v2676_v1 }
 0x454   : > { %2209 = vmatpush3.bf16.msra.mxu0 %v2447_v20 }
 0x455   : > { %2210 = vmatprep.subr.bf16.mxu0 %v2676_v1 }
 0x458   : > { %2211 = vmatpush3.bf16.msra.mxu0 %v2448_v61 }
 0x459   : > { %2212 = vmatprep.subr.bf16.mxu0 %v2676_v1 }
 0x45c   : > { %2213 = vmatpush3.bf16.msra.mxu0 %v2449_v62 }
 0x45d   : > { %2214 = vmatprep.subr.bf16.mxu0 %v2676_v1 }
 0x460   : > { %2215 = vmatpush3.bf16.msra.mxu0 %v2450_v52 }
 0x461   : > { %2216 = vmatprep.subr.bf16.mxu0 %v2676_v1 }
 0x464   : > { %v1266_v49 = vpop.f32.mrf.mxu0  ;;  %2217 = vmatpush3.bf16.msra.mxu0 %v2451_v2 }
 0x465   : > { %1714 = vxpose.xlu0.b32.start [1/16] (narrow) %v1266_v49, 16 }
 0x466   : > { %v2158_v9 = vpop.f32.mrf.mxu0 }
 0x468   : > { %v1269_v44 = vpop.f32.mrf.mxu0 }
 0x469   : > { %1715 = vxpose.xlu0.b32.cont [2/16] (narrow) %v1269_v44, 16 }
 0x46a   : > { %v2159_v47 = vpop.f32.mrf.mxu0 }
 0x494   : > { %v1329_v48 = vpop.f32.mrf.mxu1 }
 0x495   : > { %1716 = vxpose.xlu0.b32.cont [3/16] (narrow) %v1329_v48, 16 }
 0x496   : > { %v2164_v51 = vpop.f32.mrf.mxu1 }
 0x498   : > { %v1332_v46 = vpop.f32.mrf.mxu1  ;;  %v1392_v54 = vpop.f32.mrf.mxu0 }
 0x499   : > { %1717 = vxpose.xlu0.b32.cont [4/16] (narrow) %v1332_v46, 16 }
 0x49a   : > { %v2170_v56 = vpop.f32.mrf.mxu0  ;;  %v2165_v57 = vpop.f32.mrf.mxu1 }
 0x49c   : > { %v1395_v60 = vpop.f32.mrf.mxu0 }
 0x49d   : > { %1718 = vxpose.xlu0.b32.cont [5/16] (narrow) %v1392_v54, 16 }
 0x49e   : > { %v2171_v59 = vpop.f32.mrf.mxu0 }
 0x4a1   : > { %1719 = vxpose.xlu0.b32.cont [6/16] (narrow) %v1395_v60, 16 }
 0x4e5   : > { %v1455_v3 = vpop.f32.mrf.mxu1 }
 0x4e6   : > { %1720 = vxpose.xlu0.b32.cont [7/16] (narrow) %v1455_v3, 16 }
 0x4e7   : > { %v2176_v55 = vpop.f32.mrf.mxu1 }
 0x4e9   : > { %v1458_v36 = vpop.f32.mrf.mxu1  ;;  %v1518_v4 = vpop.f32.mrf.mxu0 }
 0x4ea   : > { %1721 = vxpose.xlu0.b32.cont [8/16] (narrow) %v1458_v36, 16 }
 0x4eb   : > { %v2177_v5 = vpop.f32.mrf.mxu1  ;;  %v2182_v8 = vpop.f32.mrf.mxu0 }
 0x4ed   : > { %v1521_v18 = vpop.f32.mrf.mxu0  ;;  %v1581_v33 = vpop.f32.mrf.mxu1 }
 0x4ee   : > { %1722 = vxpose.xlu0.b32.cont [9/16] (narrow) %v1518_v4, 16 }
 0x4ef   : > { %v2183_v0 = vpop.f32.mrf.mxu0  ;;  %v2188_v12 = vpop.f32.mrf.mxu1 }
 0x4f1   : > { %v1584_v28 = vpop.f32.mrf.mxu1 }
 0x4f2   : > { %1723 = vxpose.xlu0.b32.cont [10/16] (narrow) %v1521_v18, 16 }
 0x4f3   : > { %v2189_v58 = vpop.f32.mrf.mxu1 }
 0x4f6   : > { %1724 = vxpose.xlu0.b32.cont [11/16] (narrow) %v1581_v33, 16 }
 0x4f9   : > { %v1707_v1 = vpop.f32.mrf.mxu1 }
 0x4fa   : > { %1725 = vxpose.xlu0.b32.cont [12/16] (narrow) %v1584_v28, 16 }
 0x4fb   : > { %v2200_v6 = vpop.f32.mrf.mxu1 }
 0x4fd   : > { %v1710_v10 = vpop.f32.mrf.mxu1 }
 0x4ff   : > { %v2201_v15 = vpop.f32.mrf.mxu1 }
 0x507   : > { %v1644_v11 = vpop.f32.mrf.mxu0 }
 0x508   : > { %1726 = vxpose.xlu0.b32.cont [13/16] (narrow) %v1644_v11, 16 }
 0x509   : > { %v2194_v7 = vpop.f32.mrf.mxu0 }
 0x50b   : > { %v1647_v38 = vpop.f32.mrf.mxu0 }
 0x50c   : > { %1727 = vxpose.xlu0.b32.cont [14/16] (narrow) %v1647_v38, 16 }
 0x50d   : > { %v2195_v40 = vpop.f32.mrf.mxu0 }
 0x510   : > { %1728 = vxpose.xlu0.b32.cont [15/16] (narrow) %v1707_v1, 16 }
 0x514   : > { %1729 = vxpose.xlu0.b32.end [16/16] (narrow) %v1710_v10, 16 }
 0x554   : > { %v1730_v63 = vpop.trf.xlu0 }
 0x558   : > { %v1731_v14 = vpop.trf.xlu0 }
 0x559   : > { %v1746_v16 = vpack.c.bf16 %v1731_v14, %v1730_v63 }
 0x55b   : > { %2219 = vmatmul.mubr.bf16.vlgmr.msra.gmra.mxu0 %v1746_v16 }
 0x61b   : > { %v1852_v45 = vpop.f32.mrf.mxu0 }
 0x61c   : > { %v1853_v42 = vadd.f32 %v2020_v17, %v1852_v45 }
 0x61d   : > { %v2220_v19 = vpop.f32.mrf.mxu0 }
 0x61e   : > { %1859 = vst [vmem:[%s244_s29] sm:$0xff] %v1853_v42 }
 0x61f   : > { %v1855_v21 = vpop.f32.mrf.mxu0 }
 0x620   : > { %v1856_v43 = vadd.f32 %v2020_v17, %v1855_v21 }
 0x621   : > { %v2221_v35 = vpop.f32.mrf.mxu0 }
 0x622   : > { %1860 = vst [vmem:[%s244_s29 + $0x8] sm:$0xff] %v1856_v43 }
 0x623   : > { %2609 = shalt.err (!%p2606_p9)
}
 0x624   : > { %s2610_s7 = scalar_lea.hbm %s3182_s20, 256  ;;  %s2614_s27 = scalar_lea.hbm %s3229_s4, 512 }
 0x625   : > { %p2611_p13 = scmp.ne.s32.totalorder %s3182_s20, %s2610_s7  ;;  %p2615_p4 = scmp.lt.s32.totalorder %s3182_s20, %s3229_s4 }
 0x626   : > { %p2616_p8 = scmp.lt.s32.totalorder %s2614_s27, %s2610_s7 }
 0x627   : > { %p2612_p5 = pnand %p2611_p13, %p3245_p10 }
 0x628   : > { %p2617_p7 = por %p2616_p8, %p2615_p4 }
 0x629   : > { %p2613_p0 = pneg %p2612_p5 }
 0x62b   : > { %p2618_p11 = pnand %p2617_p7, %p2613_p0 }
 0x62d   : > { %2621 = shalt.err (!%p2618_p11)
}
 0x62e   : > { %s2686_s29 = smov 128   ;;  %s2687_s6 = smov 8  }
 0x62f   : > { %2232 = dma.vmem_to_hbm [thread:$0]  (%p3245_p10), %s3177_s30, 256, %s3182_s20, %s1862_s12, %s2686_s29, %s2686_s29, %s2687_s6  }
 0x630 PF: > { %s1890_s10 = sand.u32 1, %s2652_s15   ;;  %p3246_p1 = scmp.ne.s32.totalorder %s3235_s22, 0 }
 0x631   : > { %p3247_p2 = scmp.ge.s32.totalorder %s2664_s18, 2  ;;  %s1891_s14 = scalar_lea.sflag [#allocation4], %s1890_s10 }
 0x633   : > { %p2246_p6 = pnand %p3247_p2, %p3246_p1 }
 0x635   : > { %p2247_p12 = pneg %p2246_p6 }
 0x637   : > { %2647 = dma.done.wait (%p2247_p12), %s1891_s14, 256  }
 0x638   : > { %2649 = vsyncadd (%p2247_p12), %s1891_s14, 4294967040  ;;  %p18_p3 = scmp.ge.s32.totalorder %s2785_s13, 4   ;;  %s3248_s15 = smov %s2656_s16 }
 0x639   : > { %s3249_s16 = smov %s2660_s17  ;;  %s3250_s17 = smov %s2794_s24 }
 0x63a   : > { %s3251_s18 = smov %s2785_s13  ;;  %20 = sbr.rel (!%p18_p3) target bundleno = 6 (0x6), region = 89 }
 0x63f   :  { %1896 = vsyncpa [#allocation3], 1 }
 0x640   :  { %1898 = vsyncpa [#allocation3 + $0x1], 1 }
 0x641   :  { %1899 = vsyncpa [#allocation6], 1 }
 0x642   :  { %1900 = vsyncpa [#allocation4], 1 }
 0x643   :  { %1902 = vsyncpa [#allocation4 + $0x1], 1 }

</bundles_post_ra>
